<compile_context>
chip_gen: v5e
topology: v5e:2x2
jax: 0.10.0
libtpu: 0.0.40
codegen_flags: <defaults>
</compile_context>

<pallas_src>
import functools

import jax
import jax.numpy as jnp
from jax.experimental import pallas as pl
from jax.experimental.pallas import tpu as pltpu


# ----------------------------------------------------------------------------
# Pallas kernel: fused embedding gather + bundle mean + BPR scoring
# ----------------------------------------------------------------------------
def _bpr_fused_kernel(u_ids_ref, bi_ids_ref, bj_ids_ref, u_tbl_ref, i_tbl_ref, out_ref):
    u_ids = u_ids_ref[...]                                # (tb, 1) int32
    bi_ids = bi_ids_ref[...]                              # (tb, S) int32
    bj_ids = bj_ids_ref[...]                              # (tb, S) int32
    u_tbl = u_tbl_ref[...].astype(jnp.float32)            # (n_user, D)
    i_tbl = i_tbl_ref[...].astype(jnp.float32)            # (n_item, D)

    n_user = u_tbl.shape[0]
    n_item = i_tbl.shape[0]
    tb, S = bi_ids.shape

    user_lanes = jax.lax.broadcasted_iota(jnp.int32, (1, n_user), 1)   # (1, n_user)
    item_lanes = jax.lax.broadcasted_iota(jnp.int32, (1, n_item), 1)   # (1, n_item)

    # --- user gather: one-hot (tb, n_user) @ table (n_user, D) on the MXU ---
    u_hot = (u_ids == user_lanes).astype(jnp.float32)                  # (tb, n_user)
    u_emb = jnp.dot(u_hot, u_tbl, preferred_element_type=jnp.float32)  # (tb, D)

    # --- bundle gather + mean: multi-hot (with counts) folds sum over S items ---
    bi_hot = jnp.zeros((tb, n_item), jnp.float32)
    bj_hot = jnp.zeros((tb, n_item), jnp.float32)
    for s in range(S):  # S is small and static -> unrolled
        bi_hot = bi_hot + (bi_ids[:, s:s + 1] == item_lanes).astype(jnp.float32)
        bj_hot = bj_hot + (bj_ids[:, s:s + 1] == item_lanes).astype(jnp.float32)
    inv_s = jnp.float32(1.0 / S)
    bi_mean = jnp.dot(bi_hot, i_tbl, preferred_element_type=jnp.float32) * inv_s  # (tb, D)
    bj_mean = jnp.dot(bj_hot, i_tbl, preferred_element_type=jnp.float32) * inv_s  # (tb, D)

    # --- BPR logits: reduce over the embedding (lane) axis ---
    pos = jnp.sum(u_emb * bi_mean, axis=-1)               # (tb,)
    neg = jnp.sum(u_emb * bj_mean, axis=-1)               # (tb,)

    # Lane-dense combined output: (2, tb), row 0 = pos, row 1 = neg.
    out_ref[...] = jnp.stack([pos, neg], axis=0).astype(out_ref.dtype)


@functools.partial(jax.jit, static_argnames=("batch_tile",))
def bpr_forward_pallas(u_ids, bi_ids, bj_ids, user_embed, item_embed, *, batch_tile=128):
    """u_ids: (B,) int32; bi_ids/bj_ids: (B, S) int32; tables row-major (rows, D).

    Returns (pos_logits, neg_logits), each (B, 1) float32.
    """
    B = u_ids.shape[0]
    S = bi_ids.shape[1]
    n_user, D = user_embed.shape
    n_item, _ = item_embed.shape

    tb = batch_tile
    n_blocks = pl.cdiv(B, tb)
    Bp = n_blocks * tb
    pad = Bp - B

    # Pad ragged batches up to a tile multiple (id 0 is a valid row; results sliced off).
    u2 = jnp.pad(u_ids.astype(jnp.int32).reshape(B, 1), ((0, pad), (0, 0)))
    bi2 = jnp.pad(bi_ids.astype(jnp.int32), ((0, pad), (0, 0)))
    bj2 = jnp.pad(bj_ids.astype(jnp.int32), ((0, pad), (0, 0)))

    flops = (
        2 * Bp * D * (n_user + 2 * n_item)       # one-hot / multi-hot matmuls
        + Bp * (n_user + 2 * S * n_item)         # one-hot comparisons / accumulation
        + 6 * Bp * D                             # elementwise mul + reductions
    )
    bytes_accessed = 4 * (Bp * (1 + 2 * S) + (n_user + n_item) * D + 2 * Bp)

    out = pl.pallas_call(
        _bpr_fused_kernel,
        out_shape=jax.ShapeDtypeStruct((2, Bp), jnp.float32),
        grid_spec=pltpu.PrefetchScalarGridSpec(
            num_scalar_prefetch=0,
            grid=(n_blocks,),
            in_specs=[
                pl.BlockSpec((tb, 1), lambda i: (i, 0)),          # user ids tile
                pl.BlockSpec((tb, S), lambda i: (i, 0)),          # pos bundle ids tile
                pl.BlockSpec((tb, S), lambda i: (i, 0)),          # neg bundle ids tile
                pl.BlockSpec((n_user, D), lambda i: (0, 0)),      # full user table (VMEM-resident)
                pl.BlockSpec((n_item, D), lambda i: (0, 0)),      # full item table (VMEM-resident)
            ],
            out_specs=pl.BlockSpec((2, tb), lambda i: (0, i)),    # lane-dense combined output
        ),
        compiler_params=pltpu.CompilerParams(
            dimension_semantics=("parallel",),        # megacore split of the batch axis on v7x
            vmem_limit_bytes=32 * 1024 * 1024,        # within v7x's 64 MiB physical VMEM
        ),
        cost_estimate=pl.CostEstimate(
            flops=flops, transcendentals=0, bytes_accessed=bytes_accessed
        ),
    )(u2, bi2, bj2, user_embed, item_embed)

    pos = out[0, :B].reshape(B, 1)
    neg = out[1, :B].reshape(B, 1)
    return pos, neg


# ----------------------------------------------------------------------------
# Model wrapper: deterministic xavier-normal embedding tables + forward()
# ----------------------------------------------------------------------------
def init_params(key, n_user, n_item, embed_dim):
    ku, ki = jax.random.split(key)
    # xavier_normal_: std = sqrt(2 / (fan_in + fan_out)) for a (rows, cols) weight.
    u_std = (2.0 / (n_user + embed_dim)) ** 0.5
    i_std = (2.0 / (n_item + embed_dim)) ** 0.5
    user_embed = u_std * jax.random.normal(ku, (n_user, embed_dim), jnp.float32)
    item_embed = i_std * jax.random.normal(ki, (n_item, embed_dim), jnp.float32)
    return {"user_embed": user_embed, "item_embed": item_embed}


def bundle_bpr_forward(params, inputs, *, batch_tile=128):
    """inputs = (u, bi, bj, _) with u: (B,1) int, bi/bj: (B,1,S) int."""
    u_ids, bi_ids, bj_ids, _ = inputs
    B = u_ids.shape[0]
    u_flat = u_ids.reshape(B)                 # squeeze(dim=1) of the id tensor
    bi_flat = bi_ids.reshape(B, -1)           # (B, 1, S) -> (B, S)
    bj_flat = bj_ids.reshape(B, -1)
    return bpr_forward_pallas(
        u_flat, bi_flat, bj_flat,
        params["user_embed"], params["item_embed"],
        batch_tile=batch_tile,
    )


if __name__ == "__main__":
    key = jax.random.PRNGKey(0)

    conf = {"n_user": 64, "n_item": 128, "embed_dim": 32}
    B, S = 200, 4  # ragged batch (not a tile multiple) exercises padding + 2 grid steps

    pkey, ukey, ikey, jkey = jax.random.split(key, 4)
    params = init_params(pkey, conf["n_user"], conf["n_item"], conf["embed_dim"])

    u_ids = jax.random.randint(ukey, (B, 1), 0, conf["n_user"], dtype=jnp.int32)
    bi_ids = jax.random.randint(ikey, (B, 1, S), 0, conf["n_item"], dtype=jnp.int32)
    bj_ids = jax.random.randint(jkey, (B, 1, S), 0, conf["n_item"], dtype=jnp.int32)

    pos, neg = bundle_bpr_forward(params, (u_ids, bi_ids, bj_ids, None))
    jax.block_until_ready((pos, neg))

    # Pure-JAX reference check (gather -> mean -> dot, matching the PyTorch module).
    u_e = params["user_embed"][u_ids[:, 0]]
    bi_e = params["item_embed"][bi_ids[:, 0]].mean(axis=1)
    bj_e = params["item_embed"][bj_ids[:, 0]].mean(axis=1)
    pos_ref = jnp.sum(u_e * bi_e, axis=-1, keepdims=True)
    neg_ref = jnp.sum(u_e * bj_e, axis=-1, keepdims=True)

    assert pos.shape == (B, 1) and neg.shape == (B, 1)
    assert jnp.allclose(pos, pos_ref, atol=1e-5, rtol=1e-5), "pos logits mismatch"
    assert jnp.allclose(neg, neg_ref, atol=1e-5, rtol=1e-5), "neg logits mismatch"

    print("KERNEL_OK")
</pallas_src>

<mosaic_0001>
module attributes {stable_mosaic.version = 11 : i64} {
  func.func @_bpr_fused_kernel(%arg0: i32, %arg1: memref<128x1xi32, #tpu.memory_space<vmem>>, %arg2: memref<128x4xi32, #tpu.memory_space<vmem>>, %arg3: memref<128x4xi32, #tpu.memory_space<vmem>>, %arg4: memref<64x32xf32, #tpu.memory_space<vmem>>, %arg5: memref<128x32xf32, #tpu.memory_space<vmem>>, %arg6: memref<2x128xf32, #tpu.memory_space<vmem>>) attributes {dimension_semantics = [#tpu.dimension_semantics<parallel>], iteration_bounds = array<i64: 2>, scalar_prefetch = 0 : i64, scratch_operands = 0 : i64, tpu.core_type = #tpu.core_type<tc>, window_params = [{transform_indices = @transform_0, window_bounds = array<i64: 128, 1>}, {transform_indices = @transform_1, window_bounds = array<i64: 128, 4>}, {transform_indices = @transform_2, window_bounds = array<i64: 128, 4>}, {pipeline_mode = #tpu.pipeline_mode<synchronous>, transform_indices = @transform_3, window_bounds = array<i64: 64, 32>}, {pipeline_mode = #tpu.pipeline_mode<synchronous>, transform_indices = @transform_4, window_bounds = array<i64: 128, 32>}, {transform_indices = @transform_5, window_bounds = array<i64: 2, 128>}]} {
    %c0 = arith.constant 0 : index
    %c0_0 = arith.constant 0 : index
    %0 = vector.load %arg1[%c0, %c0_0] : memref<128x1xi32, #tpu.memory_space<vmem>>, vector<128x1xi32>
    %c0_1 = arith.constant 0 : index
    %c0_2 = arith.constant 0 : index
    %1 = vector.load %arg2[%c0_1, %c0_2] : memref<128x4xi32, #tpu.memory_space<vmem>>, vector<128x4xi32>
    %c0_3 = arith.constant 0 : index
    %c0_4 = arith.constant 0 : index
    %2 = vector.load %arg3[%c0_3, %c0_4] : memref<128x4xi32, #tpu.memory_space<vmem>>, vector<128x4xi32>
    %c0_5 = arith.constant 0 : index
    %c0_6 = arith.constant 0 : index
    %3 = vector.load %arg4[%c0_5, %c0_6] : memref<64x32xf32, #tpu.memory_space<vmem>>, vector<64x32xf32>
    %c0_7 = arith.constant 0 : index
    %c0_8 = arith.constant 0 : index
    %4 = vector.load %arg5[%c0_7, %c0_8] : memref<128x32xf32, #tpu.memory_space<vmem>>, vector<128x32xf32>
    %5 = tpu.iota {dimensions = array<i32: 1>} : vector<1x64xi32>
    %6 = tpu.iota {dimensions = array<i32: 1>} : vector<1x128xi32>
    %7 = vector.broadcast %0 : vector<128x1xi32> to vector<128x64xi32>
    %8 = vector.broadcast %5 : vector<1x64xi32> to vector<128x64xi32>
    %9 = arith.cmpi eq, %7, %8 : vector<128x64xi32>
    %10 = arith.extui %9 : vector<128x64xi1> to vector<128x64xi32>
    %11 = arith.sitofp %10 : vector<128x64xi32> to vector<128x64xf32>
    %cst = arith.constant dense<0.000000e+00> : vector<128x32xf32>
    %12 = tpu.matmul %11, %3, %cst {dimension_numbers = #tpu.dot_dimension_numbers<[1], [0], [0], [1], [0, 0, 1, 1], [], []>} : vector<128x64xf32>, vector<64x32xf32>, vector<128x32xf32> -> vector<128x32xf32>
    %cst_9 = arith.constant 0.000000e+00 : f32
    %13 = vector.broadcast %cst_9 : f32 to vector<128x128xf32>
    %cst_10 = arith.constant 0.000000e+00 : f32
    %14 = vector.broadcast %cst_10 : f32 to vector<128x128xf32>
    %15 = vector.extract_strided_slice %1 {offsets = [0, 0], sizes = [128, 1], strides = [1, 1]} : vector<128x4xi32> to vector<128x1xi32>
    %16 = vector.broadcast %15 : vector<128x1xi32> to vector<128x128xi32>
    %17 = vector.broadcast %6 : vector<1x128xi32> to vector<128x128xi32>
    %18 = arith.cmpi eq, %16, %17 : vector<128x128xi32>
    %19 = arith.extui %18 : vector<128x128xi1> to vector<128x128xi32>
    %20 = arith.sitofp %19 : vector<128x128xi32> to vector<128x128xf32>
    %21 = arith.addf %13, %20 : vector<128x128xf32>
    %22 = vector.extract_strided_slice %2 {offsets = [0, 0], sizes = [128, 1], strides = [1, 1]} : vector<128x4xi32> to vector<128x1xi32>
    %23 = vector.broadcast %22 : vector<128x1xi32> to vector<128x128xi32>
    %24 = vector.broadcast %6 : vector<1x128xi32> to vector<128x128xi32>
    %25 = arith.cmpi eq, %23, %24 : vector<128x128xi32>
    %26 = arith.extui %25 : vector<128x128xi1> to vector<128x128xi32>
    %27 = arith.sitofp %26 : vector<128x128xi32> to vector<128x128xf32>
    %28 = arith.addf %14, %27 : vector<128x128xf32>
    %29 = vector.extract_strided_slice %1 {offsets = [0, 1], sizes = [128, 1], strides = [1, 1]} : vector<128x4xi32> to vector<128x1xi32>
    %30 = vector.broadcast %29 : vector<128x1xi32> to vector<128x128xi32>
    %31 = vector.broadcast %6 : vector<1x128xi32> to vector<128x128xi32>
    %32 = arith.cmpi eq, %30, %31 : vector<128x128xi32>
    %33 = arith.extui %32 : vector<128x128xi1> to vector<128x128xi32>
    %34 = arith.sitofp %33 : vector<128x128xi32> to vector<128x128xf32>
    %35 = arith.addf %21, %34 : vector<128x128xf32>
    %36 = vector.extract_strided_slice %2 {offsets = [0, 1], sizes = [128, 1], strides = [1, 1]} : vector<128x4xi32> to vector<128x1xi32>
    %37 = vector.broadcast %36 : vector<128x1xi32> to vector<128x128xi32>
    %38 = vector.broadcast %6 : vector<1x128xi32> to vector<128x128xi32>
    %39 = arith.cmpi eq, %37, %38 : vector<128x128xi32>
    %40 = arith.extui %39 : vector<128x128xi1> to vector<128x128xi32>
    %41 = arith.sitofp %40 : vector<128x128xi32> to vector<128x128xf32>
    %42 = arith.addf %28, %41 : vector<128x128xf32>
    %43 = vector.extract_strided_slice %1 {offsets = [0, 2], sizes = [128, 1], strides = [1, 1]} : vector<128x4xi32> to vector<128x1xi32>
    %44 = vector.broadcast %43 : vector<128x1xi32> to vector<128x128xi32>
    %45 = vector.broadcast %6 : vector<1x128xi32> to vector<128x128xi32>
    %46 = arith.cmpi eq, %44, %45 : vector<128x128xi32>
    %47 = arith.extui %46 : vector<128x128xi1> to vector<128x128xi32>
    %48 = arith.sitofp %47 : vector<128x128xi32> to vector<128x128xf32>
    %49 = arith.addf %35, %48 : vector<128x128xf32>
    %50 = vector.extract_strided_slice %2 {offsets = [0, 2], sizes = [128, 1], strides = [1, 1]} : vector<128x4xi32> to vector<128x1xi32>
    %51 = vector.broadcast %50 : vector<128x1xi32> to vector<128x128xi32>
    %52 = vector.broadcast %6 : vector<1x128xi32> to vector<128x128xi32>
    %53 = arith.cmpi eq, %51, %52 : vector<128x128xi32>
    %54 = arith.extui %53 : vector<128x128xi1> to vector<128x128xi32>
    %55 = arith.sitofp %54 : vector<128x128xi32> to vector<128x128xf32>
    %56 = arith.addf %42, %55 : vector<128x128xf32>
    %57 = vector.extract_strided_slice %1 {offsets = [0, 3], sizes = [128, 1], strides = [1, 1]} : vector<128x4xi32> to vector<128x1xi32>
    %58 = vector.broadcast %57 : vector<128x1xi32> to vector<128x128xi32>
    %59 = vector.broadcast %6 : vector<1x128xi32> to vector<128x128xi32>
    %60 = arith.cmpi eq, %58, %59 : vector<128x128xi32>
    %61 = arith.extui %60 : vector<128x128xi1> to vector<128x128xi32>
    %62 = arith.sitofp %61 : vector<128x128xi32> to vector<128x128xf32>
    %63 = arith.addf %49, %62 : vector<128x128xf32>
    %64 = vector.extract_strided_slice %2 {offsets = [0, 3], sizes = [128, 1], strides = [1, 1]} : vector<128x4xi32> to vector<128x1xi32>
    %65 = vector.broadcast %64 : vector<128x1xi32> to vector<128x128xi32>
    %66 = vector.broadcast %6 : vector<1x128xi32> to vector<128x128xi32>
    %67 = arith.cmpi eq, %65, %66 : vector<128x128xi32>
    %68 = arith.extui %67 : vector<128x128xi1> to vector<128x128xi32>
    %69 = arith.sitofp %68 : vector<128x128xi32> to vector<128x128xf32>
    %70 = arith.addf %56, %69 : vector<128x128xf32>
    %cst_11 = arith.constant dense<0.000000e+00> : vector<128x32xf32>
    %71 = tpu.matmul %63, %4, %cst_11 {dimension_numbers = #tpu.dot_dimension_numbers<[1], [0], [0], [1], [0, 0, 1, 1], [], []>} : vector<128x128xf32>, vector<128x32xf32>, vector<128x32xf32> -> vector<128x32xf32>
    %cst_12 = arith.constant 2.500000e-01 : f32
    %72 = vector.broadcast %cst_12 : f32 to vector<128x32xf32>
    %73 = arith.mulf %71, %72 : vector<128x32xf32>
    %cst_13 = arith.constant dense<0.000000e+00> : vector<128x32xf32>
    %74 = tpu.matmul %70, %4, %cst_13 {dimension_numbers = #tpu.dot_dimension_numbers<[1], [0], [0], [1], [0, 0, 1, 1], [], []>} : vector<128x128xf32>, vector<128x32xf32>, vector<128x32xf32> -> vector<128x32xf32>
    %cst_14 = arith.constant 2.500000e-01 : f32
    %75 = vector.broadcast %cst_14 : f32 to vector<128x32xf32>
    %76 = arith.mulf %74, %75 : vector<128x32xf32>
    %77 = arith.mulf %12, %73 : vector<128x32xf32>
    %cst_15 = arith.constant dense<0.000000e+00> : vector<128xf32>
    %78 = vector.multi_reduction <add>, %77, %cst_15 [1] : vector<128x32xf32> to vector<128xf32>
    %79 = arith.mulf %12, %76 : vector<128x32xf32>
    %cst_16 = arith.constant dense<0.000000e+00> : vector<128xf32>
    %80 = vector.multi_reduction <add>, %79, %cst_16 [1] : vector<128x32xf32> to vector<128xf32>
    %81 = vector.shape_cast %78 : vector<128xf32> to vector<1x128xf32>
    %82 = vector.shape_cast %80 : vector<128xf32> to vector<1x128xf32>
    %83 = tpu.concatenate %81, %82 in 0 : vector<1x128xf32>, vector<1x128xf32> -> vector<2x128xf32>
    %c0_17 = arith.constant 0 : index
    %c0_18 = arith.constant 0 : index
    %84 = vector.load %arg6[%c0_17, %c0_18] : memref<2x128xf32, #tpu.memory_space<vmem>>, vector<2x128xf32>
    tpu.vector_store %arg6[%c0_17, %c0_18], %83 {strides = array<i32>} : memref<2x128xf32, #tpu.memory_space<vmem>>, vector<2x128xf32>,
    return
  }
  func.func @transform_0(%arg0: i32) -> (i32, i32) {
    %c0_i32 = arith.constant 0 : i32
    %c0_i32_0 = arith.constant 0 : i32
    return %arg0, %c0_i32 : i32, i32
  }
  func.func @transform_1(%arg0: i32) -> (i32, i32) {
    %c0_i32 = arith.constant 0 : i32
    %c0_i32_0 = arith.constant 0 : i32
    return %arg0, %c0_i32 : i32, i32
  }
  func.func @transform_2(%arg0: i32) -> (i32, i32) {
    %c0_i32 = arith.constant 0 : i32
    %c0_i32_0 = arith.constant 0 : i32
    return %arg0, %c0_i32 : i32, i32
  }
  func.func @transform_3(%arg0: i32) -> (i32, i32) {
    %c0_i32 = arith.constant 0 : i32
    %c0_i32_0 = arith.constant 0 : i32
    %c0_i32_1 = arith.constant 0 : i32
    return %c0_i32, %c0_i32_0 : i32, i32
  }
  func.func @transform_4(%arg0: i32) -> (i32, i32) {
    %c0_i32 = arith.constant 0 : i32
    %c0_i32_0 = arith.constant 0 : i32
    %c0_i32_1 = arith.constant 0 : i32
    return %c0_i32, %c0_i32_0 : i32, i32
  }
  func.func @transform_5(%arg0: i32) -> (i32, i32) {
    %c0_i32 = arith.constant 0 : i32
    %c0_i32_0 = arith.constant 0 : i32
    return %c0_i32, %arg0 : i32, i32
  }
}

</mosaic_0001>

<bundles_post_ra>
// kernel: bpr_forward_pallas.1
= control target key start
LH: loop header
LB: loop body
LE: loop exit
PB: predicated region body
PF: predicated region fallthrough
CT: control target
= control target key end

     0   :  { %s2228_s18 = smov 0   ;;  %s3476_s0 = inlined_call_operand.vmem [shape: s32[256,1], index: 0, kind: input, shape index: {}]   ;;  %s3477_s1 = inlined_call_operand.vmem [shape: s32[256,4], index: 1, kind: input, shape index: {}]   ;;  %s3478_s2 = inlined_call_operand.vmem [shape: s32[256,4], index: 2, kind: input, shape index: {}]   ;;  %s3479_s3 = inlined_call_operand.vmem [shape: f32[64,32], index: 3, kind: input, shape index: {}]   ;;  %s3480_s4 = inlined_call_operand.vmem [shape: f32[128,32], index: 4, kind: input, shape index: {}]   ;;  %s3481_s5 = inlined_call_operand.vmem [shape: f32[2,256], index: 5, kind: output, shape index: {}]  }
   0x1 LB: > { %s2234_s19 = sadd.s32 4294967295, %s2191_s18   ;;  %p1950_p0 = scmp.ge.s32.totalorder %s2191_s18, 1  ;;  %s2191_s18 = sphi %s2228_s18, %s15_s18  }
   0x2   : > { %p210_p1 = scmp.lt.s32.totalorder %s2191_s18, 3 }
   0x4   : > { %p211_p2 = pnand %p1950_p0, %p210_p1 }
   0x6   : > { %214 = sbr.rel (%p211_p2) target bundleno = 827 (0x33b), region = 40 }
   0xb   : > { %s1951_s20 = sshll.u32 %s2234_s19, 4  ;;  %v2193_v0 = vmov 0   ;;  %v324_v28 = vld [vmem:[%s3479_s3 + $0x38] sm:$0xff]  ;;  %v323_v29 = vld [vmem:[%s3479_s3 + $0x30] sm:$0xff]  ;;  %v322_v33 = vld [vmem:[%s3479_s3 + $0x28] sm:$0xff]  ;;  %v341_v56 = vlaneseq  ;;  %vm439_vm0 = vcmask 523264  }
   0xc   : > { %2167 = vset.pattern.permute.xlu2 %v2193_v0  ;;  %2166 = vset.pattern.permute.xlu1 %v2193_v0  ;;  %p248_p3 = scmp.lt.s32.totalorder %s1951_s20, 31  ;;  %v321_v34 = vld [vmem:[%s3479_s3 + $0x20] sm:$0xff]  ;;  %v320_v35 = vld [vmem:[%s3479_s3 + $0x18] sm:$0xff]  ;;  %v319_v39 = vld [vmem:[%s3479_s3 + $0x10] sm:$0xff]  ;;  %v3482_v62 = vmov 0.0   ;;  %p265_p4 = scmp.lt.s32.totalorder %s2234_s19, 1 }
   0xd   : > { %2165 = vset.pattern.permute.xlu0 %v2193_v0  ;;  %496 = vmatpush.msra.mxu0 %v324_v28  ;;  %v318_v40 = vld [vmem:[%s3479_s3 + $0x8] sm:$0xff]  ;;  %v317_v41 = vld [vmem:[%s3479_s3] sm:$0xff]  ;;  %v2421_v58 = vand.u32 127, %v341_v56 }
   0xe   : > { %s3537_s20 = smov (!%p248_p3, %s1951_s20), 31  ;;  %s3539_s19 = smov (!%p265_p4, %s2234_s19), 1 }
   0xf   : > { %s2239_s21 = sshll.u32 %s3537_s20, 3  ;;  %497 = vmatpush.msra.mxu0 %v323_v29 }
  0x10   : > { %s2245_s24 = scalar_lea.vmem %s3476_s0, %s2239_s21  ;;  %s2266_s27 = scalar_lea.vmem %s3477_s1, %s2239_s21 }
  0x11   : > { %v273_v1 = vld [vmem:[%s2245_s24 + $0x20] sm:$0xff]  ;;  %v271_v2 = vld [vmem:[%s2245_s24 + $0x10] sm:$0xff]  ;;  %v274_v4 = vld [vmem:[%s2245_s24 + $0x28] sm:$0xff]  ;;  %s2338_s11 = scalar_lea.vmem %s3478_s2, %s2239_s21  ;;  %498 = vmatpush.msra.mxu0 %v322_v33 }
  0x12   : > { %v269_v3 = vld [vmem:[%s2245_s24] sm:$0xff]  ;;  %356 = vperm.xlu2 %2167, %v273_v1   ;;  %350 = vperm.xlu1 %2166, %v271_v2   ;;  %v272_v5 = vld [vmem:[%s2245_s24 + $0x18] sm:$0xff]  ;;  %v270_v6 = vld [vmem:[%s2245_s24 + $0x8] sm:$0xff] }
  0x13   : > { %344 = vperm.xlu0 %2165, %v269_v3   ;;  %v277_v7 = vld [vmem:[%s2245_s24 + $0x40] sm:$0xff]  ;;  %v276_v8 = vld [vmem:[%s2245_s24 + $0x38] sm:$0xff]  ;;  %v275_v9 = vld [vmem:[%s2245_s24 + $0x30] sm:$0xff]  ;;  %499 = vmatpush.msra.mxu0 %v321_v34 }
  0x14   : > { %v280_v10 = vld [vmem:[%s2245_s24 + $0x58] sm:$0xff]  ;;  %v279_v11 = vld [vmem:[%s2245_s24 + $0x50] sm:$0xff]  ;;  %v278_v12 = vld [vmem:[%s2245_s24 + $0x48] sm:$0xff] }
  0x15   : > { %v283_v13 = vld [vmem:[%s2245_s24 + $0x70] sm:$0xff]  ;;  %v282_v14 = vld [vmem:[%s2245_s24 + $0x68] sm:$0xff]  ;;  %v281_v15 = vld [vmem:[%s2245_s24 + $0x60] sm:$0xff]  ;;  %500 = vmatpush.msra.mxu0 %v320_v35 }
  0x16   : > { %v2269_v16 = vld [vmem:[%s2266_s27 + $0x8] sm:$0xff]  ;;  %v2272_v17 = vld [vmem:[%s2266_s27] sm:$0xff]  ;;  %v284_v18 = vld [vmem:[%s2245_s24 + $0x78] sm:$0xff] }
  0x17   : > { %v2278_v19 = vld [vmem:[%s2266_s27 + $0x20] sm:$0xff]  ;;  %v2281_v20 = vld [vmem:[%s2266_s27 + $0x18] sm:$0xff]  ;;  %v2284_v21 = vld [vmem:[%s2266_s27 + $0x10] sm:$0xff]  ;;  %501 = vmatpush.msra.mxu0 %v319_v39 }
  0x18   : > { %v2290_v22 = vld [vmem:[%s2266_s27 + $0x38] sm:$0xff]  ;;  %v2293_v23 = vld [vmem:[%s2266_s27 + $0x30] sm:$0xff]  ;;  %v2296_v24 = vld [vmem:[%s2266_s27 + $0x28] sm:$0xff] }
  0x19   : > { %v2302_v25 = vld [vmem:[%s2266_s27 + $0x50] sm:$0xff]  ;;  %v2305_v26 = vld [vmem:[%s2266_s27 + $0x48] sm:$0xff]  ;;  %v2308_v27 = vld [vmem:[%s2266_s27 + $0x40] sm:$0xff]  ;;  %502 = vmatpush.msra.mxu0 %v318_v40 }
  0x1a   : > { %359 = vperm.xlu2 %2167, %v274_v4   ;;  %353 = vperm.xlu1 %2166, %v272_v5   ;;  %3495 = vst [vmem:[#allocation2_spill] sm:$0xff] %v2305_v26  ;;  %v2320_v30 = vld [vmem:[%s2266_s27 + $0x68] sm:$0xff]  ;;  %v2323_v31 = vld [vmem:[%s2266_s27 + $0x60] sm:$0xff]  ;;  %v2326_v32 = vld [vmem:[%s2266_s27 + $0x58] sm:$0xff] }
  0x1b   : > { %347 = vperm.xlu0 %2165, %v270_v6   ;;  %3496 = vst [vmem:[#allocation3_spill] sm:$0xff] %v2308_v27  ;;  %v2347_v36 = vld [vmem:[%s2338_s11] sm:$0xff]  ;;  %v2350_v37 = vld [vmem:[%s2266_s27 + $0x78] sm:$0xff]  ;;  %v2353_v38 = vld [vmem:[%s2266_s27 + $0x70] sm:$0xff]  ;;  %503 = vmatpush.msra.mxu0 %v317_v41 }
  0x1c   : > { %3497 = vst [vmem:[#allocation4_spill] sm:$0xff] %v2350_v37  ;;  %v2368_v42 = vld [vmem:[%s2338_s11 + $0x18] sm:$0xff]  ;;  %v2371_v43 = vld [vmem:[%s2338_s11 + $0x10] sm:$0xff]  ;;  %v2374_v44 = vld [vmem:[%s2338_s11 + $0x8] sm:$0xff] }
  0x1d   : > { %3498 = vst [vmem:[#allocation5_spill] sm:$0xff] %v2353_v38  ;;  %v2382_v46 = vld [vmem:[%s2338_s11 + $0x30] sm:$0xff]  ;;  %v2385_v47 = vld [vmem:[%s2338_s11 + $0x28] sm:$0xff]  ;;  %v2388_v48 = vld [vmem:[%s2338_s11 + $0x20] sm:$0xff] }
  0x1e   : > { %v2396_v50 = vld [vmem:[%s2338_s11 + $0x48] sm:$0xff]  ;;  %v2399_v51 = vld [vmem:[%s2338_s11 + $0x40] sm:$0xff]  ;;  %v2402_v52 = vld [vmem:[%s2338_s11 + $0x38] sm:$0xff] }
  0x1f   : > { %v2410_v54 = vld [vmem:[%s2338_s11 + $0x60] sm:$0xff]  ;;  %v2413_v55 = vld [vmem:[%s2338_s11 + $0x58] sm:$0xff]  ;;  %v2416_v57 = vld [vmem:[%s2338_s11 + $0x50] sm:$0xff] }
  0x20   : > { %v2428_v0 = vld [vmem:[%s2338_s11 + $0x78] sm:$0xff]  ;;  %v2431_v1 = vld [vmem:[%s2338_s11 + $0x70] sm:$0xff]  ;;  %v2435_v2 = vld [vmem:[%s2338_s11 + $0x68] sm:$0xff] }
  0x21   : > { %3499 = vst [vmem:[#allocation6_spill] sm:$0xff] %v2428_v0 }
  0x22   : > { %368 = vperm.xlu2 %2167, %v277_v7   ;;  %365 = vperm.xlu1 %2166, %v276_v8   ;;  %3500 = vst [vmem:[#allocation7_spill] sm:$0xff] %v2431_v1  ;;  %v2195_v7 = vmov 1  }
  0x23   : > { %362 = vperm.xlu0 %2165, %v275_v9  }
  0x2a   : > { %377 = vperm.xlu2 %2167, %v280_v10   ;;  %374 = vperm.xlu1 %2166, %v279_v11  }
  0x2b   : > { %371 = vperm.xlu0 %2165, %v278_v12  }
  0x32   : > { %386 = vperm.xlu2 %2167, %v283_v13   ;;  %383 = vperm.xlu1 %2166, %v282_v14  }
  0x33   : > { %380 = vperm.xlu0 %2165, %v281_v15  }
  0x3a   : > { %557 = vperm.xlu2 %2167, %v2269_v16   ;;  %554 = vperm.xlu1 %2166, %v2272_v17  }
  0x3b   : > { %389 = vperm.xlu0 %2165, %v284_v18  }
  0x42   : > { %566 = vperm.xlu2 %2167, %v2278_v19   ;;  %563 = vperm.xlu1 %2166, %v2281_v20  }
  0x43   : > { %560 = vperm.xlu0 %2165, %v2284_v21  }
  0x4a   : > { %575 = vperm.xlu2 %2167, %v2290_v22   ;;  %572 = vperm.xlu1 %2166, %v2293_v23  }
  0x4b   : > { %569 = vperm.xlu0 %2165, %v2296_v24  }
  0x52   : > { %584 = vperm.xlu2 %2167, %v2302_v25   ;;  %581 = vperm.xlu1 %2166, %v2305_v26  }
  0x53   : > { %578 = vperm.xlu0 %2165, %v2308_v27  }
  0x5a   : > { %593 = vperm.xlu2 %2167, %v2320_v30   ;;  %590 = vperm.xlu1 %2166, %v2323_v31  }
  0x5b   : > { %587 = vperm.xlu0 %2165, %v2326_v32  }
  0x62   : > { %666 = vperm.xlu2 %2167, %v2347_v36   ;;  %599 = vperm.xlu1 %2166, %v2350_v37  }
  0x63   : > { %596 = vperm.xlu0 %2165, %v2353_v38  }
  0x6a   : > { %675 = vperm.xlu2 %2167, %v2368_v42   ;;  %672 = vperm.xlu1 %2166, %v2371_v43  }
  0x6b   : > { %669 = vperm.xlu0 %2165, %v2374_v44  }
  0x6c   : > { %v2379_v45 = vpop.permute.xlu2 %356 }
  0x6d   : > { %vm395_vm5 = vcmp.eq.s32.totalorder %v2379_v45, %v2421_v58 }
  0x6e   : > { %v1962_v33 = vsel %vm395_vm5, 1.0, %v3482_v62 }
  0x72   : > { %684 = vperm.xlu2 %2167, %v2382_v46   ;;  %681 = vperm.xlu1 %2166, %v2385_v47  }
  0x73   : > { %678 = vperm.xlu0 %2165, %v2388_v48  }
  0x74   : > { %v2393_v49 = vpop.permute.xlu2 %359 }
  0x75   : > { %vm396_vm6 = vcmp.eq.s32.totalorder %v2393_v49, %v2421_v58 }
  0x76   : > { %v1963_v40 = vsel %vm396_vm6, 1.0, %v3482_v62 }
  0x7a   : > { %693 = vperm.xlu2 %2167, %v2396_v50   ;;  %690 = vperm.xlu1 %2166, %v2399_v51  }
  0x7b   : > { %687 = vperm.xlu0 %2165, %v2402_v52  }
  0x7c   : > { %v2407_v53 = vpop.permute.xlu2 %368 }
  0x7d   : > { %vm399_vm9 = vcmp.eq.s32.totalorder %v2407_v53, %v2421_v58 }
  0x82   : > { %702 = vperm.xlu2 %2167, %v2410_v54   ;;  %699 = vperm.xlu1 %2166, %v2413_v55  }
  0x83   : > { %696 = vperm.xlu0 %2165, %v2416_v57  }
  0x84   : > { %v2423_v59 = vpop.permute.xlu2 %377  ;;  %v351_v60 = vpop.permute.xlu1 %350 }
  0x85   : > { %v345_v61 = vpop.permute.xlu0 %344  ;;  %vm393_vm3 = vcmp.eq.s32.totalorder %v351_v60, %v2421_v58  ;;  %vm402_vm12 = vcmp.eq.s32.totalorder %v2423_v59, %v2421_v58  ;;  %v3484_v59 = vmov 2  }
  0x86   : > { %vm391_vm1 = vcmp.eq.s32.totalorder %v345_v61, %v2421_v58  ;;  %v1960_v11 = vsel %vm393_vm3, 1.0, %v3482_v62 }
  0x87   : > { %v1958_v63 = vsel %vm391_vm1, 1.0, %v3482_v62 }
  0x88   : > { %1974 = vmatmul.msk.f32.vlgmr.msra.gmra.mxu0 %vm439_vm0, %v1958_v63 }
  0x8a   : > { %711 = vperm.xlu2 %2167, %v2428_v0   ;;  %708 = vperm.xlu1 %2166, %v2431_v1  }
  0x8b   : > { %705 = vperm.xlu0 %2165, %v2435_v2  }
  0x8c   : > { %v2440_v3 = vpop.permute.xlu2 %386  ;;  %v354_v4 = vpop.permute.xlu1 %353 }
  0x8d   : > { %v348_v5 = vpop.permute.xlu0 %347  ;;  %vm394_vm4 = vcmp.eq.s32.totalorder %v354_v4, %v2421_v58  ;;  %vm405_vm15 = vcmp.eq.s32.totalorder %v2440_v3, %v2421_v58 }
  0x8e   : > { %vm392_vm2 = vcmp.eq.s32.totalorder %v348_v5, %v2421_v58  ;;  %v1961_v15 = vsel %vm394_vm4, 1.0, %v3482_v62 }
  0x8f   : > { %v1959_v6 = vsel %vm392_vm2, 1.0, %v3482_v62 }
  0x90   : > { %1975 = vmatmul.msk.f32.gmra.mxu0 %vm439_vm0, %v1959_v6 }
  0x92   : > { %2170 = vset.pattern.permute.xlu2 %v2195_v7  ;;  %2169 = vset.pattern.permute.xlu1 %v2195_v7 }
  0x93   : > { %2168 = vset.pattern.permute.xlu0 %v2195_v7  ;;  %784 = vperm.xlu2 %2170, %v2284_v21  }
  0x94   : > { %781 = vperm.xlu1 %2169, %v2269_v16   ;;  %778 = vperm.xlu0 %2168, %v2272_v17   ;;  %v2449_v8 = vpop.permute.xlu2 %557  ;;  %v366_v9 = vpop.permute.xlu1 %365 }
  0x95   : > { %v363_v10 = vpop.permute.xlu0 %362  ;;  %vm398_vm8 = vcmp.eq.s32.totalorder %v366_v9, %v2421_v58  ;;  %v1966_v9 = vsel %vm399_vm9, 1.0, %v3482_v62 }
  0x96   : > { %vm397_vm7 = vcmp.eq.s32.totalorder %v363_v10, %v2421_v58  ;;  %v1965_v4 = vsel %vm398_vm8, 1.0, %v3482_v62 }
  0x97   : > { %v1964_v56 = vsel %vm397_vm7, 1.0, %v3482_v62 }
  0x98   : > { %1976 = vmatmul.msk.f32.gmra.mxu0 %vm439_vm0, %v1960_v11 }
  0x9b   : > { %790 = vperm.xlu2 %2170, %v2278_v19  }
  0x9c   : > { %787 = vperm.xlu1 %2169, %v2281_v20   ;;  %793 = vperm.xlu0 %2168, %v2296_v24   ;;  %v2457_v12 = vpop.permute.xlu2 %566  ;;  %v2459_v13 = vpop.permute.xlu1 %374 }
  0x9d   : > { %v372_v14 = vpop.permute.xlu0 %371  ;;  %vm401_vm11 = vcmp.eq.s32.totalorder %v2459_v13, %v2421_v58 }
  0x9e   : > { %vm400_vm10 = vcmp.eq.s32.totalorder %v372_v14, %v2421_v58 }
  0xa0   : > { %1977 = vmatmul.msk.f32.gmra.mxu0 %vm439_vm0, %v1961_v15  ;;  %v1967_v15 = vsel %vm400_vm10, 1.0, %v3482_v62 }
  0xa3   : > { %799 = vperm.xlu2 %2170, %v2290_v22  }
  0xa4   : > { %796 = vperm.xlu1 %2169, %v2293_v23   ;;  %802 = vperm.xlu0 %2168, %v2308_v27   ;;  %v2468_v18 = vpop.permute.xlu2 %575  ;;  %v2470_v28 = vpop.permute.xlu1 %383 }
  0xa5   : > { %v2472_v29 = vpop.permute.xlu0 %380  ;;  %vm404_vm14 = vcmp.eq.s32.totalorder %v2470_v28, %v2421_v58 }
  0xa6   : > { %vm403_vm13 = vcmp.eq.s32.totalorder %v2472_v29, %v2421_v58 }
  0xa8   : > { %1978 = vmatmul.msk.f32.gmra.mxu0 %vm439_vm0, %v1962_v33 }
  0xab   : > { %808 = vperm.xlu2 %2170, %v2302_v25  }
  0xac   : > { %805 = vperm.xlu1 %2169, %v2305_v26   ;;  %811 = vperm.xlu0 %2168, %v2326_v32   ;;  %v2481_v34 = vpop.permute.xlu2 %584  ;;  %v2483_v35 = vpop.permute.xlu1 %554 }
  0xad   : > { %3501 = vst [vmem:[#allocation8_spill] sm:$0xff] %v2483_v35  ;;  %v2485_v39 = vpop.permute.xlu0 %389 }
  0xae   : > { %vm406_vm1 = vcmp.eq.s32.totalorder %v2485_v39, %v2421_v58 }
  0xb0   : > { %1979 = vmatmul.msk.f32.gmra.mxu0 %vm439_vm0, %v1963_v40 }
  0xb3   : > { %817 = vperm.xlu2 %2170, %v2320_v30  }
  0xb4   : > { %814 = vperm.xlu1 %2169, %v2323_v31   ;;  %820 = vperm.xlu0 %2168, %v2353_v38   ;;  %v2493_v41 = vpop.permute.xlu2 %593  ;;  %v2495_v45 = vpop.permute.xlu1 %563 }
  0xb5   : > { %3502 = vst [vmem:[#allocation9_spill] sm:$0xff] %v2493_v41  ;;  %v2497_v49 = vpop.permute.xlu0 %560 }
  0xb6   : > { %3503 = vst [vmem:[#allocation10_spill] sm:$0xff] %v2495_v45 }
  0xb8   : > { %1980 = vmatmul.msk.f32.gmra.mxu0 %vm439_vm0, %v1964_v56  ;;  %v1968_v56 = vsel %vm401_vm11, 1.0, %v3482_v62 }
  0xbb   : > { %890 = vperm.xlu2 %2170, %v2347_v36  }
  0xbc   : > { %823 = vperm.xlu1 %2169, %v2350_v37   ;;  %893 = vperm.xlu0 %2168, %v2374_v44   ;;  %v2505_v60 = vpop.permute.xlu2 %666  ;;  %v2507_v61 = vpop.permute.xlu1 %572 }
  0xbd   : > { %3504 = vst [vmem:[#allocation11_spill] sm:$0xff] %v2505_v60  ;;  %v2509_v63 = vpop.permute.xlu0 %569 }
  0xbe   : > { %3505 = vst [vmem:[#allocation12_spill] sm:$0xff] %v2507_v61  ;;  %vm606_vm2 = vcmp.eq.s32.totalorder %v2509_v63, %v2421_v58 }
  0xc0   : > { %1981 = vmatmul.msk.f32.gmra.mxu0 %vm439_vm0, %v1965_v4 }
  0xc3   : > { %899 = vperm.xlu2 %2170, %v2368_v42  }
  0xc4   : > { %896 = vperm.xlu1 %2169, %v2371_v43   ;;  %902 = vperm.xlu0 %2168, %v2388_v48   ;;  %v2518_v5 = vpop.permute.xlu2 %675  ;;  %v2520_v6 = vpop.permute.xlu1 %581 }
  0xc5   : > { %3506 = vst [vmem:[#allocation13_spill] sm:$0xff] %v2520_v6  ;;  %v2522_v7 = vpop.permute.xlu0 %578  ;;  %vm716_vm5 = vcmp.eq.s32.totalorder %v2518_v5, %v2421_v58 }
  0xc6   : > { %vm609_vm3 = vcmp.eq.s32.totalorder %v2522_v7, %v2421_v58 }
  0xc8   : > { %1982 = vmatmul.msk.f32.gmra.mxu0 %vm439_vm0, %v1966_v9 }
  0xcb   : > { %908 = vperm.xlu2 %2170, %v2382_v46  }
  0xcc   : > { %905 = vperm.xlu1 %2169, %v2385_v47   ;;  %911 = vperm.xlu0 %2168, %v2402_v52   ;;  %v2530_v53 = vpop.permute.xlu2 %684  ;;  %v2532_v10 = vpop.permute.xlu1 %590 }
  0xcd   : > { %3507 = vst [vmem:[#allocation14_spill] sm:$0xff] %v2532_v10  ;;  %v2534_v11 = vpop.permute.xlu0 %587  ;;  %vm719_vm9 = vcmp.eq.s32.totalorder %v2530_v53, %v2421_v58 }
  0xce   : > { %vm612_vm6 = vcmp.eq.s32.totalorder %v2534_v11, %v2421_v58 }
  0xd0   : > { %1983 = vmatmul.msk.f32.gmra.mxu0 %vm439_vm0, %v1967_v15  ;;  %v1969_v15 = vsel %vm402_vm12, 1.0, %v3482_v62 }
  0xd3   : > { %917 = vperm.xlu2 %2170, %v2396_v50  }
  0xd4   : > { %914 = vperm.xlu1 %2169, %v2399_v51   ;;  %920 = vperm.xlu0 %2168, %v2416_v57   ;;  %v2543_v14 = vpop.permute.xlu2 %693  ;;  %v2545_v33 = vpop.permute.xlu1 %599 }
  0xd5   : > { %3508 = vst [vmem:[#allocation15_spill] sm:$0xff] %v2545_v33  ;;  %v2547_v40 = vpop.permute.xlu0 %596 }
  0xd6   : > { %vm615_vm10 = vcmp.eq.s32.totalorder %v2547_v40, %v2421_v58 }
  0xd8   : > { %1984 = vmatmul.msk.f32.gmra.mxu0 %vm439_vm0, %v1968_v56 }
  0xdb   : > { %926 = vperm.xlu2 %2170, %v2410_v54  }
  0xdc   : > { %923 = vperm.xlu1 %2169, %v2413_v55   ;;  %929 = vperm.xlu0 %2168, %v2435_v2   ;;  %v2556_v13 = vpop.permute.xlu2 %702  ;;  %v2558_v4 = vpop.permute.xlu1 %672 }
  0xdd   : > { %v2560_v9 = vpop.permute.xlu0 %669 }
  0xe0   : > { %1985 = vmatmul.msk.f32.gmra.mxu0 %vm439_vm0, %v1969_v15  ;;  %v1970_v15 = vsel %vm403_vm13, 1.0, %v3482_v62  ;;  %vm722_vm13 = vcmp.eq.s32.totalorder %v2543_v14, %v2421_v58 }
  0xe3   : > { %935 = vperm.xlu2 %2170, %v2428_v0  }
  0xe4   : > { %932 = vperm.xlu1 %2169, %v2431_v1   ;;  %2171 = vset.pattern.permute.xlu0 %v3484_v59  ;;  %v2569_v56 = vpop.permute.xlu2 %711  ;;  %v2571_v33 = vpop.permute.xlu1 %681 }
  0xe5   : > { %1002 = vperm.xlu0 %2171, %v2272_v17   ;;  %v2574_v60 = vpop.permute.xlu0 %678 }
  0xe8   : > { %1986 = vmatmul.msk.f32.gmra.mxu0 %vm439_vm0, %v1970_v15  ;;  %v3509_v15 = vmov 0.0  }
  0xe9   : > { %v1971_v35 = vsel %vm404_vm14, 1.0, %v3509_v15  ;;  %v1972_v1 = vsel %vm405_vm15, 1.0, %v3509_v15  ;;  %v1973_v61 = vsel %vm406_vm1, 1.0, %v3509_v15  ;;  %v1998_v41 = vsel %vm609_vm3, 1.0, %v3509_v15 }
  0xea   : > { %v2001_v5 = vsel %vm612_vm6, 1.0, %v3509_v15  ;;  %v2004_v53 = vsel %vm615_vm10, 1.0, %v3509_v15  ;;  %vm714_vm14 = vcmp.eq.s32.totalorder %v2560_v9, %v2421_v58  ;;  %vm717_vm3 = vcmp.eq.s32.totalorder %v2574_v60, %v2421_v58 }
  0xeb   : > { %2173 = vset.pattern.permute.xlu2 %v3484_v59  ;;  %v2007_v14 = vsel %vm714_vm14, 1.0, %v3509_v15  ;;  %vm603_vm14 = vcmp.eq.s32.totalorder %v2497_v49, %v2421_v58 }
  0xec   : > { %2172 = vset.pattern.permute.xlu1 %v3484_v59  ;;  %1008 = vperm.xlu2 %2173, %v2284_v21   ;;  %v2583_v29 = vpop.permute.xlu1 %690 }
  0xed   : > { %1005 = vperm.xlu1 %2172, %v2269_v16   ;;  %1017 = vperm.xlu0 %2171, %v2296_v24   ;;  %v2587_v10 = vpop.permute.xlu0 %687  ;;  %v2589_v62 = vpop.permute.xlu2 %784 }
  0xf0   : > { %1987 = vmatmul.msk.f32.gmra.mxu0 %vm439_vm0, %v1971_v35 }
  0xf4   : > { %1014 = vperm.xlu2 %2173, %v2278_v19   ;;  %v2596_v28 = vpop.permute.xlu1 %699 }
  0xf5   : > { %1011 = vperm.xlu1 %2172, %v2281_v20   ;;  %1026 = vperm.xlu0 %2171, %v2308_v27   ;;  %v2600_v59 = vpop.permute.xlu0 %696  ;;  %v2602_v0 = vpop.permute.xlu2 %790 }
  0xf8   : > { %1988 = vmatmul.msk.f32.gmra.mxu0 %vm439_vm0, %v1972_v1 }
  0xfc   : > { %1023 = vperm.xlu2 %2173, %v2290_v22   ;;  %v2609_v3 = vpop.permute.xlu1 %708 }
  0xfd   : > { %1020 = vperm.xlu1 %2172, %v2293_v23   ;;  %1035 = vperm.xlu0 %2171, %v2326_v32   ;;  %v2613_v35 = vpop.permute.xlu0 %705  ;;  %v2615_v6 = vpop.permute.xlu2 %799 }
 0x100   : > { %1989 = vmatmul.msk.f32.gmra.mxu0 %vm439_vm0, %v1973_v61 }
 0x104   : > { %1032 = vperm.xlu2 %2173, %v2302_v25  }
 0x105   : > { %1029 = vperm.xlu1 %2172, %v2305_v26   ;;  %1044 = vperm.xlu0 %2171, %v2353_v38   ;;  %v2622_v1 = vpop.permute.xlu2 %808  ;;  %v1995_v26 = vsel %vm606_vm2, 1.0, %v3509_v15  ;;  %vm725_vm2 = vcmp.eq.s32.totalorder %v2556_v13, %v2421_v58 }
 0x106   : > { %v2624_v39 = vpop.permute.xlu1 %781  ;;  %v2626_v27 = vpop.permute.xlu0 %778 }
 0x107   : > { %3510 = vst [vmem:[#allocation16_spill] sm:$0xff] %v2626_v27 }
 0x10c   : > { %1041 = vperm.xlu2 %2173, %v2320_v30  }
 0x10d   : > { %1038 = vperm.xlu1 %2172, %v2323_v31   ;;  %1117 = vperm.xlu0 %2171, %v2374_v44   ;;  %v2633_v25 = vpop.permute.xlu2 %817 }
 0x10e   : > { %v2635_v32 = vpop.permute.xlu1 %787  ;;  %v794_v61 = vpop.permute.xlu0 %793 }
 0x10f   : > { %vm830_vm0 = vcmp.eq.s32.totalorder %v794_v61, %v2421_v58 }
 0x110   : > { %v2027_v27 = vsel %vm830_vm0, 1.0, %v3509_v15  ;;  %vm715_vm0 = vcmp.eq.s32.totalorder %v2558_v4, %v2421_v58 }
 0x111   : > { %v2640_v38 = vadd.f32 %v2027_v27, %v1995_v26  ;;  %v2008_v4 = vsel %vm715_vm0, 1.0, %v3509_v15 }
 0x114   : > { %1114 = vperm.xlu2 %2173, %v2347_v36  }
 0x115   : > { %1047 = vperm.xlu1 %2172, %v2350_v37   ;;  %1126 = vperm.xlu0 %2171, %v2388_v48   ;;  %v2647_v63 = vpop.permute.xlu2 %890 }
 0x116   : > { %3511 = vst [vmem:[#allocation17_spill] sm:$0xff] %v2647_v63  ;;  %v2649_v45 = vpop.permute.xlu1 %796  ;;  %v803_v61 = vpop.permute.xlu0 %802 }
 0x117   : > { %vm833_vm4 = vcmp.eq.s32.totalorder %v803_v61, %v2421_v58 }
 0x118   : > { %v2030_v26 = vsel %vm833_vm4, 1.0, %v3509_v15 }
 0x119   : > { %v2654_v27 = vadd.f32 %v2030_v26, %v1998_v41  ;;  %v2009_v41 = vsel %vm716_vm5, 1.0, %v3509_v15 }
 0x11b   : > { %3512 = vst [vmem:[#allocation18_spill] sm:$0xff] %v2654_v27 }
 0x11c   : > { %1123 = vperm.xlu2 %2173, %v2368_v42  }
 0x11d   : > { %1120 = vperm.xlu1 %2172, %v2371_v43   ;;  %1135 = vperm.xlu0 %2171, %v2402_v52   ;;  %v900_v7 = vpop.permute.xlu2 %899 }
 0x11e   : > { %vm940_vm7 = vcmp.eq.s32.totalorder %v900_v7, %v2421_v58  ;;  %v2664_v61 = vpop.permute.xlu1 %805  ;;  %v812_v63 = vpop.permute.xlu0 %811 }
 0x11f   : > { %v2041_v26 = vsel %vm940_vm7, 1.0, %v3509_v15  ;;  %vm836_vm8 = vcmp.eq.s32.totalorder %v812_v63, %v2421_v58  ;;  %vm728_vm7 = vcmp.eq.s32.totalorder %v2569_v56, %v2421_v58 }
 0x120   : > { %v2670_v37 = vadd.f32 %v2041_v26, %v2009_v41  ;;  %v2033_v11 = vsel %vm836_vm8, 1.0, %v3509_v15  ;;  %v2012_v26 = vsel %vm719_vm9, 1.0, %v3509_v15  ;;  %vm718_vm8 = vcmp.eq.s32.totalorder %v2571_v33, %v2421_v58 }
 0x121   : > { %v2673_v27 = vadd.f32 %v2033_v11, %v2001_v5  ;;  %vm720_vm9 = vcmp.eq.s32.totalorder %v2587_v10, %v2421_v58 }
 0x122   : > { %3513 = vst [vmem:[#allocation19_spill] sm:$0xff] %v2670_v37 }
 0x124   : > { %1132 = vperm.xlu2 %2173, %v2382_v46  }
 0x125   : > { %1129 = vperm.xlu1 %2172, %v2385_v47   ;;  %1144 = vperm.xlu0 %2171, %v2416_v57   ;;  %v909_v63 = vpop.permute.xlu2 %908 }
 0x126   : > { %vm943_vm11 = vcmp.eq.s32.totalorder %v909_v63, %v2421_v58  ;;  %v2683_v7 = vpop.permute.xlu1 %814  ;;  %v821_v41 = vpop.permute.xlu0 %820 }
 0x127   : > { %3514 = vst [vmem:[#allocation20_spill] sm:$0xff] %v2683_v7  ;;  %v2044_v5 = vsel %vm943_vm11, 1.0, %v3509_v15  ;;  %vm839_vm12 = vcmp.eq.s32.totalorder %v821_v41, %v2421_v58 }
 0x128   : > { %v2689_v11 = vadd.f32 %v2044_v5, %v2012_v26  ;;  %v2036_v40 = vsel %vm839_vm12, 1.0, %v3509_v15  ;;  %v2015_v5 = vsel %vm722_vm13, 1.0, %v3509_v15  ;;  %vm827_vm13 = vcmp.eq.s32.totalorder %v2589_v62, %v2421_v58 }
 0x129   : > { %v2692_v37 = vadd.f32 %v2036_v40, %v2004_v53 }
 0x12c   : > { %1141 = vperm.xlu2 %2173, %v2396_v50  }
 0x12d   : > { %1138 = vperm.xlu1 %2172, %v2399_v51   ;;  %1153 = vperm.xlu0 %2171, %v2435_v2   ;;  %v918_v63 = vpop.permute.xlu2 %917 }
 0x12e   : > { %vm946_vm15 = vcmp.eq.s32.totalorder %v918_v63, %v2421_v58  ;;  %v2702_v41 = vpop.permute.xlu1 %823  ;;  %v894_v26 = vpop.permute.xlu0 %893  ;;  %v3493_v63 = vmov 3  }
 0x12f   : > { %v2047_v53 = vsel %vm946_vm15, 1.0, %v3509_v15  ;;  %vm938_vm1 = vcmp.eq.s32.totalorder %v894_v26, %v2421_v58  ;;  %vm721_vm15 = vcmp.eq.s32.totalorder %v2583_v29, %v2421_v58 }
 0x130   : > { %v2708_v40 = vadd.f32 %v2047_v53, %v2015_v5  ;;  %v2039_v9 = vsel %vm938_vm1, 1.0, %v3509_v15  ;;  %v2018_v5 = vsel %vm725_vm2, 1.0, %v3509_v15  ;;  %vm723_vm1 = vcmp.eq.s32.totalorder %v2600_v59, %v2421_v58 }
 0x131   : > { %v2711_v7 = vadd.f32 %v2039_v9, %v2007_v14  ;;  %v2014_v49 = vsel %vm721_vm15, 1.0, %v3509_v15  ;;  %v2016_v59 = vsel %vm723_vm1, 1.0, %v3509_v15  ;;  %vm835_vm1 = vcmp.eq.s32.totalorder %v2622_v1, %v2421_v58  ;;  %v2854_v1 = vld [vmem:[%s3480_s4 + $0x78] sm:$0xff] }
 0x132   : > { %1449 = vmatpush.msra.mxu1 %v2854_v1  ;;  %2120 = vmatpush.msra.mxu3 %v2854_v1 }
 0x133   : > { %1530 = vmatpush.msra.mxu2 %v2854_v1 }
 0x134   : > { %1150 = vperm.xlu2 %2173, %v2410_v54  }
 0x135   : > { %1147 = vperm.xlu1 %2172, %v2413_v55   ;;  %2176 = vset.pattern.permute.xlu0 %v3493_v63  ;;  %v927_v26 = vpop.permute.xlu2 %926  ;;  %v2010_v55 = vsel %vm717_vm3, 1.0, %v3509_v15 }
 0x136   : > { %vm949_vm4 = vcmp.eq.s32.totalorder %v927_v26, %v2421_v58  ;;  %v897_v53 = vpop.permute.xlu1 %896  ;;  %1341 = vperm.xlu0 %2176, %v2374_v44   ;;  %v903_v13 = vpop.permute.xlu0 %902 }
 0x137   : > { %v2050_v14 = vsel %vm949_vm4, 1.0, %v3509_v15  ;;  %vm939_vm5 = vcmp.eq.s32.totalorder %v897_v53, %v2421_v58  ;;  %vm941_vm6 = vcmp.eq.s32.totalorder %v903_v13, %v2421_v58  ;;  %v3515_v53 = vmov 3  }
 0x138   : > { %v2730_v60 = vadd.f32 %v2050_v14, %v2018_v5  ;;  %v2040_v9 = vsel %vm939_vm5, 1.0, %v3509_v15  ;;  %v2042_v26 = vsel %vm941_vm6, 1.0, %v3509_v15  ;;  %v2021_v13 = vsel %vm728_vm7, 1.0, %v3509_v15 }
 0x139   : > { %v2734_v63 = vadd.f32 %v2040_v9, %v2008_v4  ;;  %v2736_v44 = vadd.f32 %v2042_v26, %v2010_v55  ;;  %v2011_v4 = vsel %vm718_vm8, 1.0, %v3509_v15  ;;  %v2024_v26 = vsel %vm827_vm13, 1.0, %v3509_v15 }
 0x13a   : > { %vm829_vm4 = vcmp.eq.s32.totalorder %v2602_v0, %v2421_v58  ;;  %vm605_vm5 = vcmp.eq.s32.totalorder %v2457_v12, %v2421_v58  ;;  %vm724_vm6 = vcmp.eq.s32.totalorder %v2596_v28, %v2421_v58  ;;  %vm726_vm7 = vcmp.eq.s32.totalorder %v2613_v35, %v2421_v58 }
 0x13b   : > { %v1994_v0 = vsel %vm605_vm5, 1.0, %v3509_v15  ;;  %v2017_v12 = vsel %vm724_vm6, 1.0, %v3509_v15  ;;  %v2019_v35 = vsel %vm726_vm7, 1.0, %v3509_v15  ;;  %vm727_vm13 = vcmp.eq.s32.totalorder %v2609_v3, %v2421_v58 }
 0x13c   : > { %2175 = vset.pattern.permute.xlu2 %v3515_v53  ;;  %vm838_vm6 = vcmp.eq.s32.totalorder %v2633_v25, %v2421_v58 }
 0x13d   : > { %2174 = vset.pattern.permute.xlu1 %v3515_v53  ;;  %1226 = vperm.xlu2 %2175, %v2272_v17   ;;  %v936_v5 = vpop.permute.xlu2 %935  ;;  %v2013_v17 = vsel %vm720_vm9, 1.0, %v3509_v15 }
 0x13e   : > { %vm952_vm10 = vcmp.eq.s32.totalorder %v936_v5, %v2421_v58  ;;  %1338 = vperm.xlu1 %2174, %v2347_v36   ;;  %v906_v56 = vpop.permute.xlu1 %905  ;;  %1235 = vperm.xlu0 %2176, %v2281_v20   ;;  %v912_v33 = vpop.permute.xlu0 %911  ;;  %v1992_v5 = vsel %vm603_vm14, 1.0, %v3509_v15 }
 0x13f   : > { %v2053_v14 = vsel %vm952_vm10, 1.0, %v3509_v15  ;;  %vm942_vm11 = vcmp.eq.s32.totalorder %v906_v56, %v2421_v58  ;;  %vm944_vm12 = vcmp.eq.s32.totalorder %v912_v33, %v2421_v58  ;;  %v875_v56 = vadd.f32 %v2024_v26, %v1992_v5 }
 0x140   : > { %v2756_v10 = vadd.f32 %v2053_v14, %v2021_v13  ;;  %v2043_v55 = vsel %vm942_vm11, 1.0, %v3509_v15  ;;  %v2045_v36 = vsel %vm944_vm12, 1.0, %v3509_v15  ;;  %vm832_vm11 = vcmp.eq.s32.totalorder %v2615_v6, %v2421_v58 }
 0x141   : > { %v2762_v20 = vadd.f32 %v2043_v55, %v2011_v4  ;;  %v2764_v9 = vadd.f32 %v2045_v36, %v2013_v17  ;;  %v2026_v17 = vsel %vm829_vm4, 1.0, %v3509_v15  ;;  %vm608_vm12 = vcmp.eq.s32.totalorder %v2468_v18, %v2421_v58 }
 0x142   : > { %v877_v26 = vadd.f32 %v2026_v17, %v1994_v0  ;;  %v2020_v18 = vsel %vm727_vm13, 1.0, %v3509_v15 }
 0x145   : > { %1344 = vperm.xlu2 %2175, %v2371_v43  }
 0x146   : > { %1229 = vperm.xlu1 %2174, %v2269_v16   ;;  %v915_v62 = vpop.permute.xlu1 %914  ;;  %1238 = vperm.xlu0 %2176, %v2278_v19   ;;  %v921_v13 = vpop.permute.xlu0 %920 }
 0x147   : > { %vm945_vm2 = vcmp.eq.s32.totalorder %v915_v62, %v2421_v58  ;;  %vm947_vm0 = vcmp.eq.s32.totalorder %v921_v13, %v2421_v58  ;;  %v1009_v29 = vpop.permute.xlu2 %1008 }
 0x148   : > { %v2046_v43 = vsel %vm945_vm2, 1.0, %v3509_v15  ;;  %v2048_v33 = vsel %vm947_vm0, 1.0, %v3509_v15  ;;  %vm1051_vm3 = vcmp.eq.s32.totalorder %v1009_v29, %v2421_v58  ;;  %v1997_v29 = vsel %vm608_vm12, 1.0, %v3509_v15 }
 0x149   : > { %v2786_v16 = vadd.f32 %v2046_v43, %v2014_v49  ;;  %v2788_v19 = vadd.f32 %v2048_v33, %v2016_v59  ;;  %v2056_v4 = vsel %vm1051_vm3, 1.0, %v3509_v15  ;;  %v2029_v49 = vsel %vm832_vm11, 1.0, %v3509_v15 }
 0x14a   : > { %v2791_v14 = vadd.f32 %v2056_v4, %v875_v56  ;;  %v880_v43 = vadd.f32 %v2029_v49, %v1997_v29  ;;  %vm826_vm2 = vcmp.eq.s32.totalorder %v2624_v39, %v2421_v58  ;;  %vm602_vm0 = vcmp.eq.s32.totalorder %v2449_v8, %v2421_v58  ;;  %v3518_v29 = vld [vmem:[#allocation5_spill] sm:$0xff] }
 0x14b   : > { %vm611_vm3 = vcmp.eq.s32.totalorder %v2481_v34, %v2421_v58  ;;  %v2032_v33 = vsel %vm835_vm1, 1.0, %v3509_v15  ;;  %v2023_v4 = vsel %vm826_vm2, 1.0, %v3509_v15  ;;  %v1991_v8 = vsel %vm602_vm0, 1.0, %v3509_v15 }
 0x14c   : > { %v2000_v39 = vsel %vm611_vm3, 1.0, %v3509_v15  ;;  %v874_v0 = vadd.f32 %v2023_v4, %v1991_v8  ;;  %v2035_v49 = vsel %vm838_vm6, 1.0, %v3509_v15  ;;  %vm834_vm0 = vcmp.eq.s32.totalorder %v2664_v61, %v2421_v58  ;;  %v3006_v61 = vld [vmem:[%s3480_s4 + $0x20] sm:$0xff] }
 0x14d   : > { %1347 = vperm.xlu2 %2175, %v2368_v42  }
 0x14e   : > { %1232 = vperm.xlu1 %2174, %v2284_v21   ;;  %v924_v55 = vpop.permute.xlu1 %923  ;;  %1241 = vperm.xlu0 %2176, %v2296_v24   ;;  %v930_v36 = vpop.permute.xlu0 %929 }
 0x14f   : > { %vm948_vm8 = vcmp.eq.s32.totalorder %v924_v55, %v2421_v58  ;;  %vm950_vm9 = vcmp.eq.s32.totalorder %v930_v36, %v2421_v58  ;;  %v1015_v28 = vpop.permute.xlu2 %1014 }
 0x150   : > { %v2049_v42 = vsel %vm948_vm8, 1.0, %v3509_v15  ;;  %v2051_v5 = vsel %vm950_vm9, 1.0, %v3509_v15  ;;  %vm1053_vm10 = vcmp.eq.s32.totalorder %v1015_v28, %v2421_v58  ;;  %vm828_vm8 = vcmp.eq.s32.totalorder %v2635_v32, %v2421_v58  ;;  %v2897_v32 = vld [vmem:[%s3480_s4 + $0x60] sm:$0xff] }
 0x151   : > { %v2811_v21 = vadd.f32 %v2049_v42, %v2017_v12  ;;  %v2813_v24 = vadd.f32 %v2051_v5, %v2019_v35  ;;  %v2058_v62 = vsel %vm1053_vm10, 1.0, %v3509_v15  ;;  %v2887_v35 = vld [vmem:[%s3480_s4 + $0x68] sm:$0xff]  ;;  %v3516_v5 = vld [vmem:[#allocation9_spill] sm:$0xff] }
 0x152   : > { %v2818_v13 = vadd.f32 %v2058_v62, %v877_v26  ;;  %vm614_vm9 = vcmp.eq.s32.totalorder %v3516_v5, %v2421_v58  ;;  %v3517_v62 = vld [vmem:[#allocation10_spill] sm:$0xff] }
 0x153   : > { %vm604_vm10 = vcmp.eq.s32.totalorder %v3517_v62, %v2421_v58  ;;  %v3522_v62 = vld [vmem:[#allocation4_spill] sm:$0xff] }
 0x155   : > { %1262 = vperm.xlu2 %2175, %v2323_v31  }
 0x156   : > { %1350 = vperm.xlu1 %2174, %v2388_v48   ;;  %v933_v56 = vpop.permute.xlu1 %932  ;;  %1244 = vperm.xlu0 %2176, %v2293_v23  }
 0x157   : > { %vm951_vm14 = vcmp.eq.s32.totalorder %v933_v56, %v2421_v58  ;;  %v1024_v6 = vpop.permute.xlu2 %1023  ;;  %v2830_v59 = vpop.permute.xlu0 %1002  ;;  %v2025_v56 = vsel %vm828_vm8, 1.0, %v3509_v15 }
 0x158   : > { %v2052_v3 = vsel %vm951_vm14, 1.0, %v3509_v15  ;;  %vm1056_vm15 = vcmp.eq.s32.totalorder %v1024_v6, %v2421_v58  ;;  %v3519_v6 = vld [vmem:[#allocation3_spill] sm:$0xff]  ;;  %vm831_vm14 = vcmp.eq.s32.totalorder %v2649_v45, %v2421_v58  ;;  %v2956_v45 = vld [vmem:[%s3480_s4 + $0x40] sm:$0xff] }
 0x159   : > { %v2835_v31 = vadd.f32 %v2052_v3, %v2020_v18  ;;  %v2061_v48 = vsel %vm1056_vm15, 1.0, %v3509_v15  ;;  %v2003_v18 = vsel %vm614_vm9, 1.0, %v3509_v15  ;;  %v2028_v5 = vsel %vm831_vm14, 1.0, %v3509_v15 }
 0x15a   : > { %v2842_v23 = vadd.f32 %v2061_v48, %v880_v43  ;;  %v1993_v43 = vsel %vm604_vm10, 1.0, %v3509_v15  ;;  %v886_v25 = vadd.f32 %v2035_v49, %v2003_v18  ;;  %v3523_v49 = vld [vmem:[#allocation2_spill] sm:$0xff] }
 0x15d   : > { %1265 = vperm.xlu2 %2175, %v2320_v30   ;;  %v883_v30 = vadd.f32 %v2032_v33, %v2000_v39  ;;  %v876_v33 = vadd.f32 %v2025_v56, %v1993_v43 }
 0x15e   : > { %1353 = vperm.xlu1 %2174, %v2385_v47   ;;  %1247 = vperm.xlu0 %2176, %v2290_v22   ;;  %v2867_v22 = vld [vmem:[%s3480_s4 + $0x70] sm:$0xff] }
 0x15f   : > { %v1033_v34 = vpop.permute.xlu2 %1032  ;;  %v1006_v17 = vpop.permute.xlu1 %1005  ;;  %1450 = vmatpush.msra.mxu1 %v2867_v22  ;;  %2121 = vmatpush.msra.mxu3 %v2867_v22 }
 0x160   : > { %vm1059_vm4 = vcmp.eq.s32.totalorder %v1033_v34, %v2421_v58  ;;  %vm1050_vm5 = vcmp.eq.s32.totalorder %v1006_v17, %v2421_v58  ;;  %v1018_v55 = vpop.permute.xlu0 %1017  ;;  %1531 = vmatpush.msra.mxu2 %v2867_v22 }
 0x161   : > { %v2064_v47 = vsel %vm1059_vm4, 1.0, %v3509_v15  ;;  %v2055_v36 = vsel %vm1050_vm5, 1.0, %v3509_v15  ;;  %vm1054_vm7 = vcmp.eq.s32.totalorder %v1018_v55, %v2421_v58  ;;  %1451 = vmatpush.msra.mxu1 %v2887_v35  ;;  %2122 = vmatpush.msra.mxu3 %v2887_v35  ;;  %v3520_v55 = vld [vmem:[#allocation18_spill] sm:$0xff] }
 0x162   : > { %v2879_v12 = vadd.f32 %v2064_v47, %v883_v30  ;;  %v2881_v26 = vadd.f32 %v2055_v36, %v874_v0  ;;  %v2059_v28 = vsel %vm1054_vm7, 1.0, %v3509_v15  ;;  %1532 = vmatpush.msra.mxu2 %v2887_v35  ;;  %v2946_v0 = vld [vmem:[%s3480_s4 + $0x48] sm:$0xff]  ;;  %v3521_v36 = vld [vmem:[#allocation12_spill] sm:$0xff] }
 0x163   : > { %v2891_v42 = vadd.f32 %v2059_v28, %v2640_v38  ;;  %v2907_v38 = vld [vmem:[%s3480_s4 + $0x58] sm:$0xff]  ;;  %1452 = vmatpush.msra.mxu1 %v2897_v32  ;;  %2123 = vmatpush.msra.mxu3 %v2897_v32  ;;  %vm607_vm15 = vcmp.eq.s32.totalorder %v3521_v36, %v2421_v58 }
 0x164   : > { %1533 = vmatpush.msra.mxu2 %v2897_v32  ;;  %v2964_v28 = vld [vmem:[%s3480_s4 + $0x38] sm:$0xff]  ;;  %v1996_v56 = vsel %vm607_vm15, 1.0, %v3509_v15 }
 0x165   : > { %1268 = vperm.xlu2 %2175, %v3518_v29   ;;  %1453 = vmatpush.msra.mxu1 %v2907_v38  ;;  %v879_v18 = vadd.f32 %v2028_v5, %v1996_v56 }
 0x166   : > { %1356 = vperm.xlu1 %2174, %v2382_v46   ;;  %1250 = vperm.xlu0 %2176, %v3519_v6   ;;  %v2928_v46 = vld [vmem:[%s3480_s4 + $0x50] sm:$0xff] }
 0x167   : > { %v1042_v3 = vpop.permute.xlu2 %1041  ;;  %v1012_v48 = vpop.permute.xlu1 %1011  ;;  %1454 = vmatpush.msra.mxu1 %v2928_v46  ;;  %2124 = vmatpush.msra.mxu3 %v2907_v38 }
 0x168   : > { %vm1062_vm11 = vcmp.eq.s32.totalorder %v1042_v3, %v2421_v58  ;;  %vm1052_vm12 = vcmp.eq.s32.totalorder %v1012_v48, %v2421_v58  ;;  %v1027_v4 = vpop.permute.xlu0 %1026  ;;  %1534 = vmatpush.msra.mxu2 %v2907_v38  ;;  %v2981_v3 = vld [vmem:[%s3480_s4 + $0x30] sm:$0xff] }
 0x169   : > { %v2067_v8 = vsel %vm1062_vm11, 1.0, %v3509_v15  ;;  %v2057_v39 = vsel %vm1052_vm12, 1.0, %v3509_v15  ;;  %vm1057_vm13 = vcmp.eq.s32.totalorder %v1027_v4, %v2421_v58  ;;  %1455 = vmatpush.msra.mxu1 %v2946_v0  ;;  %2125 = vmatpush.msra.mxu3 %v2928_v46 }
 0x16a   : > { %v2938_v34 = vadd.f32 %v2067_v8, %v886_v25  ;;  %v2940_v17 = vadd.f32 %v2057_v39, %v876_v33  ;;  %v2062_v30 = vsel %vm1057_vm13, 1.0, %v3509_v15  ;;  %1535 = vmatpush.msra.mxu2 %v2928_v46  ;;  %v2996_v33 = vld [vmem:[%s3480_s4 + $0x28] sm:$0xff]  ;;  %v3524_v8 = vld [vmem:[#allocation13_spill] sm:$0xff]  ;;  %vm1049_vm13 = vcmp.eq.s32.totalorder %v2830_v59, %v2421_v58 }
 0x16b   : > { %v2950_v47 = vadd.f32 %v2062_v30, %v3520_v55  ;;  %1456 = vmatpush.msra.mxu1 %v2956_v45  ;;  %2126 = vmatpush.msra.mxu3 %v2946_v0  ;;  %vm610_vm3 = vcmp.eq.s32.totalorder %v3524_v8, %v2421_v58  ;;  %v3014_v39 = vld [vmem:[%s3480_s4 + $0x18] sm:$0xff]  ;;  %v3525_v30 = vld [vmem:[#allocation7_spill] sm:$0xff] }
 0x16c   : > { %1536 = vmatpush.msra.mxu2 %v2946_v0  ;;  %v1999_v55 = vsel %vm610_vm3, 1.0, %v3509_v15  ;;  %v2184_v59 = vld [vmem:[%s2266_s27 + $0x58] sm:$0xff] }
 0x16d   : > { %1271 = vperm.xlu2 %2175, %v3522_v62   ;;  %1457 = vmatpush.msra.mxu1 %v2964_v28 }
 0x16e   : > { %1359 = vperm.xlu1 %2174, %v2402_v52   ;;  %1253 = vperm.xlu0 %2176, %v3523_v49  }
 0x16f   : > { %v2973_v29 = vpop.permute.xlu2 %1114  ;;  %v1021_v6 = vpop.permute.xlu1 %1020  ;;  %1458 = vmatpush.msra.mxu1 %v2981_v3  ;;  %2127 = vmatpush.msra.mxu3 %v2956_v45 }
 0x170   : > { %vm1055_vm1 = vcmp.eq.s32.totalorder %v1021_v6, %v2421_v58  ;;  %v1036_v43 = vpop.permute.xlu0 %1035  ;;  %1537 = vmatpush.msra.mxu2 %v2956_v45  ;;  %v3526_v6 = vld [vmem:[#allocation19_spill] sm:$0xff] }
 0x171   : > { %v2060_v52 = vsel %vm1055_vm1, 1.0, %v3509_v15  ;;  %vm1060_vm2 = vcmp.eq.s32.totalorder %v1036_v43, %v2421_v58  ;;  %1459 = vmatpush.msra.mxu1 %v2996_v33  ;;  %2128 = vmatpush.msra.mxu3 %v2964_v28 }
 0x172   : > { %v2990_v48 = vadd.f32 %v2060_v52, %v879_v18  ;;  %v2065_v25 = vsel %vm1060_vm2, 1.0, %v3509_v15  ;;  %1538 = vmatpush.msra.mxu2 %v2964_v28 }
 0x173   : > { %v3000_v4 = vadd.f32 %v2065_v25, %v2673_v27  ;;  %v2031_v27 = vsel %vm834_vm0, 1.0, %v3509_v15  ;;  %1460 = vmatpush.msra.mxu1 %v3006_v61  ;;  %2129 = vmatpush.msra.mxu3 %v2981_v3  ;;  %v3047_v25 = vld [vmem:[%s3480_s4 + $0x8] sm:$0xff] }
 0x174   : > { %v882_v62 = vadd.f32 %v2031_v27, %v1999_v55  ;;  %1539 = vmatpush.msra.mxu2 %v2981_v3  ;;  %v3057_v27 = vld [vmem:[%s3480_s4] sm:$0xff]  ;;  %v3527_v55 = vmov 2  }
 0x175   : > { %1374 = vperm.xlu2 %2175, %v2410_v54   ;;  %1461 = vmatpush.msra.mxu1 %v3014_v39 }
 0x176   : > { %1362 = vperm.xlu1 %2174, %v2399_v51   ;;  %1380 = vperm.xlu0 %2176, %v3525_v30   ;;  %v3030_v51 = vld [vmem:[%s3480_s4 + $0x10] sm:$0xff] }
 0x177   : > { %v1124_v36 = vpop.permute.xlu2 %1123  ;;  %v1030_v5 = vpop.permute.xlu1 %1029  ;;  %1462 = vmatpush.msra.mxu1 %v3030_v51  ;;  %2130 = vmatpush.msra.mxu3 %v2996_v33 }
 0x178   : > { %vm1164_vm4 = vcmp.eq.s32.totalorder %v1124_v36, %v2421_v58  ;;  %vm1058_vm5 = vcmp.eq.s32.totalorder %v1030_v5, %v2421_v58  ;;  %v1045_v54 = vpop.permute.xlu0 %1044  ;;  %1540 = vmatpush.msra.mxu2 %v2996_v33  ;;  %v3528_v5 = vld [vmem:[#allocation6_spill] sm:$0xff] }
 0x179   : > { %v2073_v49 = vsel %vm1164_vm4, 1.0, %v3509_v15  ;;  %v2063_v56 = vsel %vm1058_vm5, 1.0, %v3509_v15  ;;  %vm1063_vm6 = vcmp.eq.s32.totalorder %v1045_v54, %v2421_v58  ;;  %1463 = vmatpush.msra.mxu1 %v3047_v25  ;;  %2131 = vmatpush.msra.mxu3 %v3006_v61 }
 0x17a   : > { %v3039_v18 = vadd.f32 %v2073_v49, %v3526_v6  ;;  %v3041_v43 = vadd.f32 %v2063_v56, %v882_v62  ;;  %v2068_v52 = vsel %vm1063_vm6, 1.0, %v3509_v15  ;;  %1541 = vmatpush.msra.mxu2 %v3006_v61 }
 0x17b   : > { %v3051_v8 = vadd.f32 %v2068_v52, %v2692_v37  ;;  %1464 = vmatpush.msra.mxu1 %v3057_v27  ;;  %2132 = vmatpush.msra.mxu3 %v3014_v39 }
 0x17c   : > { %1542 = vmatpush.msra.mxu2 %v3014_v39 }
 0x17d   : > { %1377 = vperm.xlu2 %2175, %v2435_v2   ;;  %2133 = vmatpush.msra.mxu3 %v3030_v51 }
 0x17e   : > { %1365 = vperm.xlu1 %2174, %v2396_v50   ;;  %2179 = vset.pattern.permute.xlu0 %v3527_v55 }
 0x17f   : > { %v1133_v37 = vpop.permute.xlu2 %1132  ;;  %v3065_v36 = vpop.permute.xlu1 %1038  ;;  %1159 = vperm.xlu0 %2179, %v3528_v5   ;;  %1543 = vmatpush.msra.mxu2 %v3030_v51  ;;  %v2054_v5 = vsel %vm1049_vm13, 1.0, %v3509_v15 }
 0x180   : > { %vm1167_vm7 = vcmp.eq.s32.totalorder %v1133_v37, %v2421_v58  ;;  %v3070_v62 = vpop.permute.xlu0 %1117  ;;  %2134 = vmatpush.msra.mxu3 %v3047_v25  ;;  %vm1061_vm5 = vcmp.eq.s32.totalorder %v3065_v36, %v2421_v58 }
 0x181   : > { %v2076_v2 = vsel %vm1167_vm7, 1.0, %v3509_v15  ;;  %1544 = vmatpush.msra.mxu2 %v3047_v25  ;;  %vm1161_vm7 = vcmp.eq.s32.totalorder %v2973_v29, %v2421_v58 }
 0x182   : > { %v3076_v50 = vadd.f32 %v2076_v2, %v2689_v11  ;;  %2135 = vmatpush.msra.mxu3 %v3057_v27  ;;  %v2183_v2 = vld [vmem:[%s2338_s11 + $0x78] sm:$0xff] }
 0x183   : > { %1545 = vmatpush.msra.mxu2 %v3057_v27 }
 0x184   : > { %2136 = vmatpush.msrb.mxu3 %v2854_v1  ;;  %v2181_v1 = vld [vmem:[%s2266_s27 + $0x50] sm:$0xff]  ;;  %s1957_s27 = sshll.u32 %s3539_s19, 1 }
 0x185   : > { %2177 = vset.pattern.permute.xlu2 %v3527_v55  ;;  %s268_s13 = scalar_lea.vmem %s3481_s5, %s1957_s27 }
 0x186   : > { %1368 = vperm.xlu1 %2174, %v2416_v57   ;;  %1156 = vperm.xlu2 %2177, %v3525_v30  }
 0x187   : > { %v1142_v54 = vpop.permute.xlu2 %1141  ;;  %v3085_v49 = vpop.permute.xlu1 %1047  ;;  %2180 = vset.pattern.permute.xlu0 %v3515_v53  ;;  %2137 = vmatpush.msrb.mxu3 %v2867_v22  ;;  %v2182_v22 = vld [vmem:[%s2338_s11 + $0x58] sm:$0xff] }
 0x188   : > { %vm1170_vm8 = vcmp.eq.s32.totalorder %v1142_v54, %v2421_v58  ;;  %v1127_v11 = vpop.permute.xlu0 %1126 }
 0x189   : > { %v2079_v56 = vsel %vm1170_vm8, 1.0, %v3509_v15  ;;  %vm1165_vm9 = vcmp.eq.s32.totalorder %v1127_v11, %v2421_v58  ;;  %2138 = vmatpush.msrb.mxu3 %v2887_v35 }
 0x18a   : > { %v3095_v57 = vadd.f32 %v2079_v56, %v2708_v40  ;;  %v2074_v30 = vsel %vm1165_vm9, 1.0, %v3509_v15  ;;  %v3529_v40 = vld [vmem:[#allocation16_spill] sm:$0xff] }
 0x18b   : > { %v3099_v6 = vadd.f32 %v2074_v30, %v2736_v44  ;;  %2139 = vmatpush.msrb.mxu3 %v2897_v32  ;;  %vm825_vm10 = vcmp.eq.s32.totalorder %v3529_v40, %v2421_v58 }
 0x18c   : > { %v2022_v32 = vsel %vm825_vm10, 1.0, %v3509_v15  ;;  %vm1162_vm10 = vcmp.eq.s32.totalorder %v3070_v62, %v2421_v58 }
 0x18d   : > { %2140 = vmatpush.msrb.mxu3 %v2907_v38 }
 0x18e   : > { %1256 = vperm.xlu1 %2174, %v2181_v1   ;;  %2178 = vset.pattern.permute.xlu2 %v3515_v53  ;;  %v3530_v53 = vld [vmem:[#allocation8_spill] sm:$0xff] }
 0x18f   : > { %v3105_v52 = vpop.permute.xlu2 %1150  ;;  %v3107_v55 = vpop.permute.xlu1 %1120  ;;  %1371 = vperm.xlu2 %2178, %v2182_v22   ;;  %2141 = vmatpush.msrb.mxu3 %v2928_v46  ;;  %vm601_vm12 = vcmp.eq.s32.totalorder %v3530_v53, %v2421_v58  ;;  %v3532_v53 = vld [vmem:[#allocation17_spill] sm:$0xff] }
 0x190   : > { %v1136_v44 = vpop.permute.xlu0 %1135  ;;  %v1990_v37 = vsel %vm601_vm12, 1.0, %v3509_v15  ;;  %vm937_vm3 = vcmp.eq.s32.totalorder %v3532_v53, %v2421_v58 }
 0x191   : > { %vm1168_vm11 = vcmp.eq.s32.totalorder %v1136_v44, %v2421_v58  ;;  %2142 = vmatpush.msrb.mxu3 %v2946_v0  ;;  %v873_v46 = vadd.f32 %v2022_v32, %v1990_v37  ;;  %v2038_v32 = vsel %vm937_vm3, 1.0, %v3509_v15 }
 0x192   : > { %v2077_v35 = vsel %vm1168_vm11, 1.0, %v3509_v15 }
 0x193   : > { %v3122_v38 = vadd.f32 %v2077_v35, %v2764_v9  ;;  %2143 = vmatpush.msrb.mxu3 %v2956_v45  ;;  %v1097_v9 = vadd.f32 %v2054_v5, %v873_v46  ;;  %v2066_v5 = vsel %vm1061_vm5, 1.0, %v3509_v15 }
 0x195   : > { %2144 = vmatpush.msrb.mxu3 %v2964_v28 }
 0x196   : > { %1383 = vperm.xlu1 %2174, %v2183_v2  }
 0x197   : > { %v3129_v54 = vpop.permute.xlu1 %1129  ;;  %1259 = vperm.xlu2 %2178, %v2184_v59   ;;  %v1227_v11 = vpop.permute.xlu2 %1226  ;;  %2145 = vmatpush.msrb.mxu3 %v2981_v3 }
 0x198   : > { %v1145_v56 = vpop.permute.xlu0 %1144  ;;  %vm1273_vm14 = vcmp.eq.s32.totalorder %v1227_v11, %v2421_v58 }
 0x199   : > { %vm1171_vm15 = vcmp.eq.s32.totalorder %v1145_v56, %v2421_v58  ;;  %v2086_v0 = vsel %vm1273_vm14, 1.0, %v3509_v15  ;;  %2146 = vmatpush.msrb.mxu3 %v2996_v33  ;;  %vm1163_vm14 = vcmp.eq.s32.totalorder %v3107_v55, %v2421_v58 }
 0x19a   : > { %v2080_v45 = vsel %vm1171_vm15, 1.0, %v3509_v15  ;;  %v1321_v30 = vadd.f32 %v2086_v0, %v1097_v9 }
 0x19b   : > { %v3139_v1 = vadd.f32 %v2080_v45, %v2788_v19  ;;  %2147 = vmatpush.msrb.mxu3 %v3006_v61 }
 0x19c   : > { %1465 = vmatmul.f32.vlgmr.msra.gmra.mxu1 %v1321_v30 }
 0x19d   : > { %2148 = vmatpush.msrb.mxu3 %v3014_v39  ;;  %v3531_v39 = vld [vmem:[#allocation20_spill] sm:$0xff] }
 0x19e   : > { %vm837_vm2 = vcmp.eq.s32.totalorder %v3531_v39, %v2421_v58 }
 0x19f   : > { %v1139_v28 = vpop.permute.xlu1 %1138  ;;  %v3143_v22 = vpop.permute.xlu2 %1344  ;;  %2149 = vmatpush.msrb.mxu3 %v3030_v51  ;;  %v2034_v35 = vsel %vm837_vm2, 1.0, %v3509_v15 }
 0x1a0   : > { %vm1169_vm1 = vcmp.eq.s32.totalorder %v1139_v28, %v2421_v58  ;;  %v3147_v40 = vpop.permute.xlu0 %1153  ;;  %vm1387_vm15 = vcmp.eq.s32.totalorder %v3143_v22, %v2421_v58  ;;  %v3535_v22 = vld [vmem:[#allocation15_spill] sm:$0xff] }
 0x1a1   : > { %v2078_v3 = vsel %vm1169_vm1, 1.0, %v3509_v15  ;;  %2150 = vmatpush.msrb.mxu3 %v3047_v25  ;;  %vm840_vm1 = vcmp.eq.s32.totalorder %v2702_v41, %v2421_v58  ;;  %vm616_vm3 = vcmp.eq.s32.totalorder %v3535_v22, %v2421_v58 }
 0x1a2   : > { %v3152_v19 = vadd.f32 %v2078_v3, %v2786_v16  ;;  %v3533_v16 = vld [vmem:[#allocation14_spill] sm:$0xff]  ;;  %v2071_v3 = vsel %vm1162_vm10, 1.0, %v3509_v15 }
 0x1a3   : > { %2151 = vmatpush.msrb.mxu3 %v3057_v27  ;;  %vm613_vm4 = vcmp.eq.s32.totalorder %v3533_v16, %v2421_v58  ;;  %v3534_v27 = vld [vmem:[#allocation11_spill] sm:$0xff]  ;;  %v1210_v16 = vadd.f32 %v2071_v3, %v2711_v7  ;;  %v2072_v7 = vsel %vm1163_vm14, 1.0, %v3509_v15 }
 0x1a4   : > { %vm713_vm6 = vcmp.eq.s32.totalorder %v3534_v27, %v2421_v58  ;;  %v2002_v37 = vsel %vm613_vm4, 1.0, %v3509_v15  ;;  %vm1064_vm4 = vcmp.eq.s32.totalorder %v3085_v49, %v2421_v58 }
 0x1a5   : > { %v2006_v46 = vsel %vm713_vm6, 1.0, %v3509_v15  ;;  %v885_v36 = vadd.f32 %v2034_v35, %v2002_v37 }
 0x1a6   : > { %v985_v2 = vadd.f32 %v2038_v32, %v2006_v46 }
 0x1a7   : > { %v1148_v33 = vpop.permute.xlu1 %1147  ;;  %v3156_v61 = vpop.permute.xlu2 %1347  ;;  %v1109_v11 = vadd.f32 %v2066_v5, %v885_v36 }
 0x1a8   : > { %vm1172_vm0 = vcmp.eq.s32.totalorder %v1148_v33, %v2421_v58  ;;  %v1342_v44 = vpop.permute.xlu0 %1341  ;;  %vm1388_vm5 = vcmp.eq.s32.totalorder %v3156_v61, %v2421_v58 }
 0x1a9   : > { %v2081_v51 = vsel %vm1172_vm0, 1.0, %v3509_v15  ;;  %vm1386_vm11 = vcmp.eq.s32.totalorder %v1342_v44, %v2421_v58 }
 0x1aa   : > { %v3169_v25 = vadd.f32 %v2081_v51, %v2811_v21  ;;  %v2070_v21 = vsel %vm1161_vm7, 1.0, %v3509_v15  ;;  %v2103_v39 = vsel %vm1386_vm11, 1.0, %v3509_v15 }
 0x1ab   : > { %v1209_v0 = vadd.f32 %v2070_v21, %v985_v2  ;;  %v1434_v32 = vadd.f32 %v2103_v39, %v1210_v16  ;;  %v2037_v21 = vsel %vm840_vm1, 1.0, %v3509_v15 }
 0x1af   : > { %v1263_v59 = vpop.permute.xlu2 %1262 }
 0x1b0   : > { %vm1285_vm8 = vcmp.eq.s32.totalorder %v1263_v59, %v2421_v58  ;;  %v1339_v9 = vpop.permute.xlu1 %1338  ;;  %v1236_v56 = vpop.permute.xlu0 %1235 }
 0x1b1   : > { %v2098_v29 = vsel %vm1285_vm8, 1.0, %v3509_v15  ;;  %vm1385_vm9 = vcmp.eq.s32.totalorder %v1339_v9, %v2421_v58  ;;  %vm1276_vm6 = vcmp.eq.s32.totalorder %v1236_v56, %v2421_v58  ;;  %vm1173_vm8 = vcmp.eq.s32.totalorder %v3105_v52, %v2421_v58 }
 0x1b2   : > { %v2102_v45 = vsel %vm1385_vm9, 1.0, %v3509_v15  ;;  %v1333_v30 = vadd.f32 %v2098_v29, %v1109_v11  ;;  %v2069_v11 = vsel %vm1064_vm4, 1.0, %v3509_v15  ;;  %v2082_v3 = vsel %vm1173_vm8, 1.0, %v3509_v15 }
 0x1b3   : > { %v1433_v28 = vadd.f32 %v2102_v45, %v1209_v0  ;;  %v2105_v0 = vsel %vm1388_vm5, 1.0, %v3509_v15  ;;  %v1221_v39 = vadd.f32 %v2082_v3, %v2730_v60 }
 0x1b4   : > { %1501 = vmatmul.f32.vlgmr.msra.gmra.mxu3 %v1333_v30 }
 0x1b5   : > { %1546 = vmatmul.f32.vlgmr.msra.gmra.mxu2 %v1433_v28  ;;  %v1436_v28 = vadd.f32 %v2105_v0, %v3039_v18 }
 0x1b7   : > { %v1266_v33 = vpop.permute.xlu2 %1265 }
 0x1b8   : > { %vm1286_vm12 = vcmp.eq.s32.totalorder %v1266_v33, %v2421_v58  ;;  %v1230_v53 = vpop.permute.xlu1 %1229  ;;  %v1239_v51 = vpop.permute.xlu0 %1238 }
 0x1b9   : > { %v2099_v27 = vsel %vm1286_vm12, 1.0, %v3509_v15  ;;  %vm1274_vm13 = vcmp.eq.s32.totalorder %v1230_v53, %v2421_v58  ;;  %vm1277_vm9 = vcmp.eq.s32.totalorder %v1239_v51, %v2421_v58  ;;  %vm1174_vm12 = vcmp.eq.s32.totalorder %v3147_v40, %v2421_v58 }
 0x1ba   : > { %v2087_v62 = vsel %vm1274_vm13, 1.0, %v3509_v15  ;;  %v1334_v44 = vadd.f32 %v2099_v27, %v2938_v34  ;;  %v2104_v34 = vsel %vm1387_vm15, 1.0, %v3509_v15  ;;  %v2090_v53 = vsel %vm1277_vm9, 1.0, %v3509_v15 }
 0x1bb   : > { %v1322_v35 = vadd.f32 %v2087_v62, %v2881_v26  ;;  %v1211_v26 = vadd.f32 %v2072_v7, %v2734_v63  ;;  %v2005_v63 = vsel %vm616_vm3, 1.0, %v3509_v15  ;;  %vm1166_vm13 = vcmp.eq.s32.totalorder %v3129_v54, %v2421_v58 }
 0x1bc   : > { %1504 = vmatmul.f32.gmra.mxu3 %v1334_v44  ;;  %v888_v49 = vadd.f32 %v2037_v21, %v2005_v63  ;;  %v1325_v27 = vadd.f32 %v2090_v53, %v2818_v13  ;;  %v2083_v62 = vsel %vm1174_vm12, 1.0, %v3509_v15  ;;  %v2075_v44 = vsel %vm1166_vm13, 1.0, %v3509_v15 }
 0x1bd   : > { %1468 = vmatmul.f32.gmra.mxu1 %v1322_v35  ;;  %1549 = vmatmul.f32.gmra.mxu2 %v1434_v32  ;;  %v1435_v59 = vadd.f32 %v2104_v34, %v1211_v26  ;;  %v1222_v35 = vadd.f32 %v2083_v62, %v2813_v24  ;;  %v1214_v7 = vadd.f32 %v2075_v44, %v2762_v20 }
 0x1bf   : > { %v1269_v37 = vpop.permute.xlu2 %1268 }
 0x1c0   : > { %vm1287_vm2 = vcmp.eq.s32.totalorder %v1269_v37, %v2421_v58  ;;  %v1233_v55 = vpop.permute.xlu1 %1232  ;;  %v1242_v5 = vpop.permute.xlu0 %1241 }
 0x1c1   : > { %v2100_v46 = vsel %vm1287_vm2, 1.0, %v3509_v15  ;;  %vm1275_vm0 = vcmp.eq.s32.totalorder %v1233_v55, %v2421_v58  ;;  %vm1278_vm14 = vcmp.eq.s32.totalorder %v1242_v5, %v2421_v58 }
 0x1c2   : > { %v2088_v41 = vsel %vm1275_vm0, 1.0, %v3509_v15  ;;  %v1335_v36 = vadd.f32 %v2100_v46, %v3051_v8  ;;  %v1112_v8 = vadd.f32 %v2069_v11, %v888_v49  ;;  %v2091_v54 = vsel %vm1278_vm14, 1.0, %v3509_v15 }
 0x1c3   : > { %v1323_v2 = vadd.f32 %v2088_v41, %v2791_v14  ;;  %v2089_v14 = vsel %vm1276_vm6, 1.0, %v3509_v15  ;;  %v1326_v55 = vadd.f32 %v2091_v54, %v2891_v42 }
 0x1c4   : > { %1507 = vmatmul.f32.gmra.mxu3 %v1335_v36  ;;  %v1324_v56 = vadd.f32 %v2089_v14, %v2940_v17 }
 0x1c5   : > { %1471 = vmatmul.f32.gmra.mxu1 %v1323_v2  ;;  %1552 = vmatmul.f32.gmra.mxu2 %v1435_v59 }
 0x1c7   : > { %v1272_v9 = vpop.permute.xlu2 %1271 }
 0x1c8   : > { %vm1288_vm7 = vcmp.eq.s32.totalorder %v1272_v9, %v2421_v58  ;;  %v1351_v29 = vpop.permute.xlu1 %1350  ;;  %v1245_v45 = vpop.permute.xlu0 %1244 }
 0x1c9   : > { %v2101_v30 = vsel %vm1288_vm7, 1.0, %v3509_v15  ;;  %vm1389_vm10 = vcmp.eq.s32.totalorder %v1351_v29, %v2421_v58  ;;  %vm1279_vm2 = vcmp.eq.s32.totalorder %v1245_v45, %v2421_v58 }
 0x1ca   : > { %v1336_v61 = vadd.f32 %v2101_v30, %v1112_v8  ;;  %v2106_v52 = vsel %vm1389_vm10, 1.0, %v3509_v15  ;;  %v2092_v24 = vsel %vm1279_vm2, 1.0, %v3509_v15  ;;  %vm1627_vm2 = vcmask 261120  }
 0x1cb   : > { %v1437_v60 = vadd.f32 %v2106_v52, %v3099_v6  ;;  %v1327_v41 = vadd.f32 %v2092_v24, %v2990_v48 }
 0x1cc   : > { %1510 = vmatmul.f32.gmra.mxu3 %v1336_v61 }
 0x1cd   : > { %1474 = vmatmul.f32.gmra.mxu1 %v1324_v56  ;;  %1555 = vmatmul.f32.gmra.mxu2 %v1436_v28 }
 0x1cf   : > { %v1375_v33 = vpop.permute.xlu2 %1374 }
 0x1d0   : > { %vm1397_vm11 = vcmp.eq.s32.totalorder %v1375_v33, %v2421_v58  ;;  %v1354_v17 = vpop.permute.xlu1 %1353  ;;  %v1248_v18 = vpop.permute.xlu0 %1247 }
 0x1d1   : > { %v2114_v16 = vsel %vm1397_vm11, 1.0, %v3509_v15  ;;  %vm1390_vm15 = vcmp.eq.s32.totalorder %v1354_v17, %v2421_v58  ;;  %vm1280_vm4 = vcmp.eq.s32.totalorder %v1248_v18, %v2421_v58 }
 0x1d2   : > { %v1445_v51 = vadd.f32 %v2114_v16, %v1221_v39  ;;  %v2107_v13 = vsel %vm1390_vm15, 1.0, %v3509_v15  ;;  %v2093_v21 = vsel %vm1280_vm4, 1.0, %v3509_v15  ;;  %vm1767_vm4 = vcmask 261312  }
 0x1d3   : > { %v1438_v5 = vadd.f32 %v2107_v13, %v1214_v7 }
 0x1d4   : > { %1582 = vmatmul.f32.vlgmr.msrb.gmra.mxu3 %v1445_v51 }
 0x1d5   : > { %1477 = vmatmul.f32.gmra.mxu1 %v1325_v27  ;;  %1558 = vmatmul.f32.gmra.mxu2 %v1437_v60 }
 0x1d7   : > { %v1378_v40 = vpop.permute.xlu2 %1377 }
 0x1d8   : > { %vm1398_vm1 = vcmp.eq.s32.totalorder %v1378_v40, %v2421_v58  ;;  %v1357_v6 = vpop.permute.xlu1 %1356  ;;  %v1251_v32 = vpop.permute.xlu0 %1250 }
 0x1d9   : > { %v2115_v37 = vsel %vm1398_vm1, 1.0, %v3509_v15  ;;  %vm1391_vm0 = vcmp.eq.s32.totalorder %v1357_v6, %v2421_v58  ;;  %vm1281_vm7 = vcmp.eq.s32.totalorder %v1251_v32, %v2421_v58 }
 0x1da   : > { %v1446_v34 = vadd.f32 %v2115_v37, %v1222_v35  ;;  %v2108_v26 = vsel %vm1391_vm0, 1.0, %v3509_v15  ;;  %v2094_v8 = vsel %vm1281_vm7, 1.0, %v3509_v15  ;;  %vm1759_vm0 = vcmask 130112  }
 0x1db   : > { %v1439_v42 = vadd.f32 %v2108_v26, %v3076_v50  ;;  %v1328_v50 = vadd.f32 %v2093_v21, %v2842_v23  ;;  %v1329_v14 = vadd.f32 %v2094_v8, %v2950_v47  ;;  %vm1779_vm7 = vcmask 458112  }
 0x1dc   : > { %1585 = vmatmul.f32.gmra.mxu3 %v1446_v34 }
 0x1dd   : > { %1480 = vmatmul.f32.gmra.mxu1 %v1326_v55  ;;  %1561 = vmatmul.f32.gmra.mxu2 %v1438_v5 }
 0x1e0   : > { %v1360_v46 = vpop.permute.xlu1 %1359  ;;  %v1254_v22 = vpop.permute.xlu0 %1253 }
 0x1e1   : > { %v1157_v20 = vpop.permute.xlu2 %1156  ;;  %vm1392_vm5 = vcmp.eq.s32.totalorder %v1360_v46, %v2421_v58  ;;  %vm1282_vm9 = vcmp.eq.s32.totalorder %v1254_v22, %v2421_v58 }
 0x1e2   : > { %vm1175_vm3 = vcmp.eq.s32.totalorder %v1157_v20, %v2421_v58  ;;  %v2109_v2 = vsel %vm1392_vm5, 1.0, %v3509_v15  ;;  %v2095_v23 = vsel %vm1282_vm9, 1.0, %v3509_v15  ;;  %vm1771_vm5 = vcmask 326912  }
 0x1e3   : > { %v2084_v36 = vsel %vm1175_vm3, 1.0, %v3509_v15  ;;  %v1440_v49 = vadd.f32 %v2109_v2, %v3122_v38  ;;  %v1330_v61 = vadd.f32 %v2095_v23, %v3041_v43  ;;  %vm1763_vm3 = vcmask 195712  }
 0x1e4   : > { %v1223_v11 = vadd.f32 %v2084_v36, %v2835_v31  ;;  %vm1787_vm9 = vcmask 589312  }
 0x1e5   : > { %1483 = vmatmul.f32.gmra.mxu1 %v1327_v41  ;;  %1564 = vmatmul.f32.gmra.mxu2 %v1439_v42 }
 0x1e8   : > { %v1363_v59 = vpop.permute.xlu1 %1362  ;;  %v1381_v63 = vpop.permute.xlu0 %1380 }
 0x1e9   : > { %vm1399_vm6 = vcmp.eq.s32.totalorder %v1381_v63, %v2421_v58  ;;  %vm1393_vm8 = vcmp.eq.s32.totalorder %v1363_v59, %v2421_v58  ;;  %v1372_v38 = vpop.permute.xlu2 %1371 }
 0x1ea   : > { %v2116_v48 = vsel %vm1399_vm6, 1.0, %v3509_v15  ;;  %v2110_v31 = vsel %vm1393_vm8, 1.0, %v3509_v15  ;;  %vm1396_vm14 = vcmp.eq.s32.totalorder %v1372_v38, %v2421_v58  ;;  %vm1775_vm6 = vcmask 392512  }
 0x1eb   : > { %v1447_v9 = vadd.f32 %v2116_v48, %v1223_v11  ;;  %v1441_v29 = vadd.f32 %v2110_v31, %v3152_v19  ;;  %v2113_v53 = vsel %vm1396_vm14, 1.0, %v3509_v15  ;;  %vm1783_vm8 = vcmask 523712  }
 0x1ec   : > { %v1444_v51 = vadd.f32 %v2113_v53, %v3169_v25  ;;  %vm1807_vm14 = vcmask 917312  }
 0x1ed   : > { %1486 = vmatmul.f32.gmra.mxu1 %v1328_v50  ;;  %1567 = vmatmul.f32.gmra.mxu2 %v1440_v49 }
 0x1ee   : > { %1588 = vmatmul.f32.gmra.mxu3 %v1447_v9 }
 0x1f0   : > { %v1366_v0 = vpop.permute.xlu1 %1365 }
 0x1f1   : > { %vm1394_vm10 = vcmp.eq.s32.totalorder %v1366_v0, %v2421_v58  ;;  %v1160_v47 = vpop.permute.xlu0 %1159  ;;  %v1260_v3 = vpop.permute.xlu2 %1259 }
 0x1f2   : > { %v2111_v45 = vsel %vm1394_vm10, 1.0, %v3509_v15  ;;  %vm1176_vm13 = vcmp.eq.s32.totalorder %v1160_v47, %v2421_v58  ;;  %vm1284_vm15 = vcmp.eq.s32.totalorder %v1260_v3, %v2421_v58  ;;  %vm1791_vm10 = vcmask 654912  }
 0x1f3   : > { %v1442_v56 = vadd.f32 %v2111_v45, %v3095_v57  ;;  %v2085_v57 = vsel %vm1176_vm13, 1.0, %v3509_v15  ;;  %v2097_v52 = vsel %vm1284_vm15, 1.0, %v3509_v15  ;;  %vm1803_vm13 = vcmask 851712  }
 0x1f4   : > { %v1224_v18 = vadd.f32 %v2085_v57, %v2756_v10  ;;  %v1332_v16 = vadd.f32 %v2097_v52, %v3000_v4  ;;  %vm1811_vm15 = vcmask 982912  }
 0x1f5   : > { %1489 = vmatmul.f32.gmra.mxu1 %v1329_v14  ;;  %1570 = vmatmul.f32.gmra.mxu2 %v1441_v29 }
 0x1f8   : > { %v1369_v30 = vpop.permute.xlu1 %1368 }
 0x1f9   : > { %vm1395_vm11 = vcmp.eq.s32.totalorder %v1369_v30, %v2421_v58 }
 0x1fa   : > { %v2112_v19 = vsel %vm1395_vm11, 1.0, %v3509_v15  ;;  %vm1795_vm11 = vcmask 720512  }
 0x1fb   : > { %v1443_v43 = vadd.f32 %v2112_v19, %v3139_v1 }
 0x1fd   : > { %1492 = vmatmul.f32.gmra.mxu1 %v1330_v61  ;;  %1573 = vmatmul.f32.gmra.mxu2 %v1442_v56 }
 0x200   : > { %v1257_v28 = vpop.permute.xlu1 %1256 }
 0x201   : > { %vm1283_vm12 = vcmp.eq.s32.totalorder %v1257_v28, %v2421_v58 }
 0x202   : > { %v2096_v33 = vsel %vm1283_vm12, 1.0, %v3509_v15  ;;  %vm1799_vm12 = vcmask 786112  }
 0x203   : > { %v1331_v39 = vadd.f32 %v2096_v33, %v2879_v12  ;;  %v3298_v12 = vpop.f32.mrf.mxu0 }
 0x205   : > { %1495 = vmatmul.f32.gmra.mxu1 %v1331_v39  ;;  %1576 = vmatmul.f32.gmra.mxu2 %v1443_v43 }
 0x208   : > { %v1384_v17 = vpop.permute.xlu1 %1383 }
 0x209   : > { %vm1400_vm1 = vcmp.eq.s32.totalorder %v1384_v17, %v2421_v58 }
 0x20a   : > { %v2117_v1 = vsel %vm1400_vm1, 1.0, %v3509_v15  ;;  %vm1815_vm1 = vcmask 1048512  }
 0x20b   : > { %v1448_v27 = vadd.f32 %v2117_v1, %v1224_v18  ;;  %v3303_v60 = vpop.f32.mrf.mxu0 }
 0x20d   : > { %1498 = vmatmul.f32.gmra.mxu1 %v1332_v16  ;;  %1579 = vmatmul.f32.gmra.mxu2 %v1444_v51 }
 0x20e   : > { %1591 = vmatmul.f32.gmra.mxu3 %v1448_v27 }
 0x213   : > { %v3306_v40 = vpop.f32.mrf.mxu0 }
 0x219   : > { %v1466_v62 = vpop.f32.mrf.mxu1 }
 0x21a   : > { %v1514_v44 = vmul.f32 0.25, %v1466_v62 }
 0x21b   : > { %v3309_v15 = vpop.f32.mrf.mxu0 }
 0x21c   : > { %v1611_v10 = vmul.f32 %v1514_v44, %v3298_v12 }
 0x21e   : > { %v1628_v35 = vsel %vm1627_vm2, %v1611_v10, 0.0 }
 0x21f   : > { %1629 = vadd.xlane.f32.xlu1 %v1628_v35 }
 0x223   : > { %v3311_v4 = vpop.f32.mrf.mxu0 }
 0x22b   : > { %v3315_v6 = vpop.f32.mrf.mxu0 }
 0x233   : > { %v3322_v24 = vpop.f32.mrf.mxu0 }
 0x237   : > { %v1502_v3 = vpop.f32.mrf.mxu3 }
 0x238   : > { %v3313_v25 = vpop.f32.mrf.mxu2  ;;  %v1526_v27 = vmul.f32 0.25, %v1502_v3 }
 0x23a   : > { %v1469_v54 = vpop.f32.mrf.mxu1 }
 0x23b   : > { %v1515_v13 = vmul.f32 0.25, %v1469_v54  ;;  %v3327_v36 = vpop.f32.mrf.mxu0 }
 0x23d   : > { %v1612_v32 = vmul.f32 %v1515_v13, %v3303_v60 }
 0x23f   : > { %v1631_v7 = vsel %vm1627_vm2, %v1612_v32, 0.0  ;;  %v3353_v1 = vpop.f32.mrf.mxu3  ;;  %v1595_v32 = vmul.f32 0.25, %v3313_v25 }
 0x240   : > { %1632 = vadd.xlane.f32.xlu2 %v1631_v7  ;;  %v3319_v37 = vpop.f32.mrf.mxu2 }
 0x242   : > { %v1472_v34 = vpop.f32.mrf.mxu1 }
 0x243   : > { %v1516_v55 = vmul.f32 0.25, %v1472_v34  ;;  %v3335_v50 = vpop.f32.mrf.mxu0 }
 0x245   : > { %v1613_v5 = vmul.f32 %v1516_v55, %v3306_v40 }
 0x247   : > { %v1634_v26 = vsel %vm1627_vm2, %v1613_v5, 0.0  ;;  %v3362_v7 = vpop.f32.mrf.mxu3 }
 0x248   : > { %1635 = vadd.xlane.f32.xlu0 %v1634_v26  ;;  %v1553_v46 = vpop.f32.mrf.mxu2 }
 0x249   : > { %v1597_v34 = vmul.f32 0.25, %v1553_v46 }
 0x24a   : > { %v1475_v22 = vpop.f32.mrf.mxu1 }
 0x24b   : > { %v1517_v20 = vmul.f32 0.25, %v1475_v22  ;;  %v3339_v23 = vpop.f32.mrf.mxu0  ;;  %v1676_v22 = vmul.f32 %v1595_v32, %v3298_v12 }
 0x24d   : > { %v1614_v41 = vmul.f32 %v1517_v20, %v3309_v15  ;;  %v1692_v25 = vsel %vm1627_vm2, %v1676_v22, 0.0 }
 0x24f   : > { %v1637_v42 = vsel %vm1627_vm2, %v1614_v41, 0.0  ;;  %v1678_v41 = vmul.f32 %v1597_v34, %v3306_v40  ;;  %v1757_v34 = vadd.s32 4294967288, %v2421_v58 }
 0x250   : > { %v3329_v21 = vpop.f32.mrf.mxu2  ;;  %1638 = vadd.xlane.f32.xlu2 %v1637_v42 }
 0x252   : > { %v1478_v2 = vpop.f32.mrf.mxu1 }
 0x253   : > { %v1518_v59 = vmul.f32 0.25, %v1478_v2  ;;  %v3344_v19 = vpop.f32.mrf.mxu0 }
 0x255   : > { %v1615_v63 = vmul.f32 %v1518_v59, %v3311_v4  ;;  %v1598_v59 = vmul.f32 0.25, %v3329_v21 }
 0x257   : > { %v1640_v11 = vsel %vm1627_vm2, %v1615_v63, 0.0  ;;  %v1698_v63 = vsel %vm1627_vm2, %v1678_v41, 0.0  ;;  %v1679_v40 = vmul.f32 %v1598_v59, %v3309_v15 }
 0x258   : > { %v3333_v48 = vpop.f32.mrf.mxu2  ;;  %1641 = vadd.xlane.f32.xlu1 %v1640_v11 }
 0x25a   : > { %v1481_v49 = vpop.f32.mrf.mxu1 }
 0x25b   : > { %v1519_v9 = vmul.f32 0.25, %v1481_v49  ;;  %v3351_v52 = vpop.f32.mrf.mxu0  ;;  %v1596_v49 = vmul.f32 0.25, %v3319_v37 }
 0x25d   : > { %v1616_v8 = vmul.f32 %v1519_v9, %v3315_v6  ;;  %v1511_v9 = vpop.f32.mrf.mxu3 }
 0x25f   : > { %v1643_v31 = vsel %vm1627_vm2, %v1616_v8, 0.0 }
 0x260   : > { %v1562_v0 = vpop.f32.mrf.mxu2  ;;  %1644 = vadd.xlane.f32.xlu2 %v1643_v31  ;;  %v1677_v31 = vmul.f32 %v1596_v49, %v3303_v60 }
 0x261   : > { %v1600_v46 = vmul.f32 0.25, %v1562_v0 }
 0x262   : > { %v1484_v14 = vpop.f32.mrf.mxu1  ;;  %v1695_v37 = vsel %vm1627_vm2, %v1677_v31, 0.0 }
 0x263   : > { %v1520_v29 = vmul.f32 0.25, %v1484_v14  ;;  %v3357_v44 = vpop.f32.mrf.mxu0  ;;  %v1681_v8 = vmul.f32 %v1600_v46, %v3315_v6 }
 0x264   : > { %v1623_v35 = vmul.f32 %v1526_v27, %v3357_v44 }
 0x265   : > { %v1617_v38 = vmul.f32 %v1520_v29, %v3322_v24  ;;  %v1707_v0 = vsel %vm1627_vm2, %v1681_v8, 0.0  ;;  %v1701_v29 = vsel %vm1627_vm2, %v1679_v40, 0.0 }
 0x266   : > { %v1664_v55 = vsel %vm1627_vm2, %v1623_v35, 0.0 }
 0x267   : > { %v1646_v45 = vsel %vm1627_vm2, %v1617_v38, 0.0  ;;  %v1599_v38 = vmul.f32 0.25, %v3333_v48 }
 0x268   : > { %1647 = vadd.xlane.f32.xlu0 %v1646_v45  ;;  %v1565_v30 = vpop.f32.mrf.mxu2  ;;  %v1583_v45 = vpop.f32.mrf.mxu3 }
 0x269   : > { %v1601_v14 = vmul.f32 0.25, %v1565_v30  ;;  %v1680_v60 = vmul.f32 %v1599_v38, %v3311_v4 }
 0x26a   : > { %v1487_v61 = vpop.f32.mrf.mxu1 }
 0x26b   : > { %v1521_v56 = vmul.f32 0.25, %v1487_v61  ;;  %v1682_v15 = vmul.f32 %v1601_v14, %v3322_v24  ;;  %v544_v61 = vpop.f32.mrf.mxu0 }
 0x26d   : > { %v1618_v47 = vmul.f32 %v1521_v56, %v3327_v36  ;;  %v1710_v48 = vsel %vm1627_vm2, %v1682_v15, 0.0 }
 0x26f   : > { %v1649_v28 = vsel %vm1627_vm2, %v1618_v47, 0.0 }
 0x270   : > { %1650 = vadd.xlane.f32.xlu1 %v1649_v28  ;;  %v3347_v43 = vpop.f32.mrf.mxu2  ;;  %v1586_v4 = vpop.f32.mrf.mxu3 }
 0x271   : > { %v1602_v3 = vmul.f32 0.25, %v3347_v43 }
 0x272   : > { %v1490_v33 = vpop.f32.mrf.mxu1 }
 0x273   : > { %v1522_v39 = vmul.f32 0.25, %v1490_v33  ;;  %v1704_v33 = vsel %vm1627_vm2, %v1680_v60, 0.0 }
 0x275   : > { %v1619_v57 = vmul.f32 %v1522_v39, %v3335_v50  ;;  %v1683_v39 = vmul.f32 %v1602_v3, %v3327_v36  ;;  %v1528_v36 = vmul.f32 0.25, %v3362_v7 }
 0x277   : > { %v1652_v53 = vsel %vm1627_vm2, %v1619_v57, 0.0  ;;  %v1607_v57 = vmul.f32 0.25, %v1583_v45 }
 0x278   : > { %1653 = vadd.xlane.f32.xlu2 %v1652_v53  ;;  %v1571_v51 = vpop.f32.mrf.mxu2  ;;  %v1608_v53 = vmul.f32 0.25, %v1586_v4 }
 0x279   : > { %v1603_v21 = vmul.f32 0.25, %v1571_v51  ;;  %v1713_v51 = vsel %vm1627_vm2, %v1683_v39, 0.0  ;;  %v1765_v39 = vadd.s32 4294967272, %v2421_v58 }
 0x27a   : > { %v1493_v17 = vpop.f32.mrf.mxu1  ;;  %v1689_v27 = vmul.f32 %v1608_v53, %v544_v61 }
 0x27b   : > { %v1523_v18 = vmul.f32 0.25, %v1493_v17  ;;  %v1684_v6 = vmul.f32 %v1603_v21, %v3335_v50 }
 0x27c   : > { %v1731_v35 = vsel %vm1627_vm2, %v1689_v27, 0.0 }
 0x27d   : > { %v1620_v16 = vmul.f32 %v1523_v18, %v3339_v23  ;;  %v1716_v28 = vsel %vm1627_vm2, %v1684_v6, 0.0 }
 0x27f   : > { %v1655_v62 = vsel %vm1627_vm2, %v1620_v16, 0.0  ;;  %v547_v16 = vpop.f32.mrf.mxu0 }
 0x280   : > { %1656 = vadd.xlane.f32.xlu0 %v1655_v62  ;;  %v1574_v26 = vpop.f32.mrf.mxu2 }
 0x281   : > { %v1604_v56 = vmul.f32 0.25, %v1574_v26 }
 0x282   : > { %v1496_v10 = vpop.f32.mrf.mxu1 }
 0x283   : > { %v1524_v54 = vmul.f32 0.25, %v1496_v10  ;;  %v1685_v24 = vmul.f32 %v1604_v56, %v3339_v23  ;;  %v1688_v23 = vmul.f32 %v1607_v57, %v3357_v44  ;;  %v1529_v10 = vmul.f32 0.25, %v1511_v9 }
 0x285   : > { %v1621_v13 = vmul.f32 %v1524_v54, %v3344_v19  ;;  %v1719_v18 = vsel %vm1627_vm2, %v1685_v24, 0.0  ;;  %v1728_v54 = vsel %vm1627_vm2, %v1688_v23, 0.0 }
 0x287   : > { %v1658_v5 = vsel %vm1627_vm2, %v1621_v13, 0.0  ;;  %v1527_v13 = vmul.f32 0.25, %v3353_v1 }
 0x288   : > { %1665 = vadd.xlane.f32.xlu0 %v1664_v55  ;;  %1659 = vadd.xlane.f32.xlu1 %v1658_v5  ;;  %v1577_v12 = vpop.f32.mrf.mxu2  ;;  %v550_v55 = vpop.f32.mrf.mxu0  ;;  %v1625_v5 = vmul.f32 %v1528_v36, %v547_v16 }
 0x289   : > { %v1605_v43 = vmul.f32 0.25, %v1577_v12  ;;  %v1624_v26 = vmul.f32 %v1527_v13, %v544_v61 }
 0x28a   : > { %v1499_v20 = vpop.f32.mrf.mxu1 }
 0x28b   : > { %v1525_v42 = vmul.f32 0.25, %v1499_v20  ;;  %v1686_v62 = vmul.f32 %v1605_v43, %v3344_v19  ;;  %v1626_v19 = vmul.f32 %v1529_v10, %v550_v55  ;;  %v1667_v46 = vsel %vm1627_vm2, %v1624_v26, 0.0 }
 0x28c   : > { %v1773_v43 = vadd.s32 4294967256, %v2421_v58  ;;  %v1777_v10 = vadd.s32 4294967248, %v2421_v58 }
 0x28d   : > { %v1622_v2 = vmul.f32 %v1525_v42, %v3351_v52  ;;  %v1722_v32 = vsel %vm1627_vm2, %v1686_v62, 0.0  ;;  %v1781_v62 = vadd.s32 4294967240, %v2421_v58 }
 0x28f   : > { %v1661_v11 = vsel %vm1627_vm2, %v1622_v2, 0.0  ;;  %v1673_v2 = vsel %vm1627_vm2, %v1626_v19, 0.0 }
 0x290   : > { %1699 = vadd.xlane.f32.xlu0 %v1698_v63  ;;  %1693 = vadd.xlane.f32.xlu1 %v1692_v25  ;;  %v1580_v30 = vpop.f32.mrf.mxu2  ;;  %v1670_v25 = vsel %vm1627_vm2, %v1625_v5, 0.0 }
 0x291   : > { %1662 = vadd.xlane.f32.xlu2 %v1661_v11  ;;  %v1606_v47 = vmul.f32 0.25, %v1580_v30 }
 0x292   : > { %v1630_v44 = vpop.xlane.xlu1 %1629 }
 0x293   : > { %v1687_v50 = vmul.f32 %v1606_v47, %v3351_v52  ;;  %v1589_v52 = vpop.f32.mrf.mxu3  ;;  %v1756_v20 = vperm.slane %v1630_v44, %v2421_v58 }
 0x294   : > { %v1609_v59 = vmul.f32 0.25, %v1589_v52 }
 0x295   : > { %v1725_v17 = vsel %vm1627_vm2, %v1687_v50, 0.0  ;;  %v1769_v50 = vadd.s32 4294967264, %v2421_v58 }
 0x296   : > { %v1690_v11 = vmul.f32 %v1609_v59, %v547_v16 }
 0x298   : > { %1708 = vadd.xlane.f32.xlu0 %v1707_v0  ;;  %1702 = vadd.xlane.f32.xlu1 %v1701_v29  ;;  %v1734_v9 = vsel %vm1627_vm2, %v1690_v11, 0.0 }
 0x299   : > { %1696 = vadd.xlane.f32.xlu2 %v1695_v37 }
 0x29b   : > { %v1592_v22 = vpop.f32.mrf.mxu3 }
 0x29c   : > { %v1610_v42 = vmul.f32 0.25, %v1592_v22 }
 0x29e   : > { %v1691_v63 = vmul.f32 %v1610_v42, %v550_v55 }
 0x2a0   : > { %1717 = vadd.xlane.f32.xlu0 %v1716_v28  ;;  %1711 = vadd.xlane.f32.xlu1 %v1710_v48  ;;  %v1737_v49 = vsel %vm1627_vm2, %v1691_v63, 0.0  ;;  %vm1866_vm2 = vcmask 1040384  }
 0x2a1   : > { %1705 = vadd.xlane.f32.xlu2 %v1704_v33  ;;  %v1761_v33 = vadd.s32 4294967280, %v2421_v58 }
 0x2a8   : > { %1726 = vadd.xlane.f32.xlu0 %v1725_v17  ;;  %1720 = vadd.xlane.f32.xlu1 %v1719_v18 }
 0x2a9   : > { %1714 = vadd.xlane.f32.xlu2 %v1713_v51 }
 0x2b0   : > { %1732 = vadd.xlane.f32.xlu0 %v1731_v35  ;;  %1729 = vadd.xlane.f32.xlu1 %v1728_v54 }
 0x2b1   : > { %1723 = vadd.xlane.f32.xlu2 %v1722_v32 }
 0x2b3   : > { %v1633_v7 = vpop.xlane.xlu2 %1632 }
 0x2b4   : > { %v1758_v41 = vperm.slane %v1633_v7, %v1757_v34  ;;  %v1789_v7 = vadd.s32 4294967224, %v2421_v58 }
 0x2b6   : > { %v3404_v1 = vsel %vm1759_vm0, %v1758_v41, %v1756_v20  ;;  %v1793_v20 = vadd.s32 4294967216, %v2421_v58 }
 0x2b8   : > { %1674 = vadd.xlane.f32.xlu0 %v1673_v2  ;;  %1671 = vadd.xlane.f32.xlu1 %v1670_v25  ;;  %v1797_v25 = vadd.s32 4294967208, %v2421_v58 }
 0x2b9   : > { %1668 = vadd.xlane.f32.xlu2 %v1667_v46 }
 0x2bb   : > { %v1636_v12 = vpop.xlane.xlu0 %1635 }
 0x2bc   : > { %v1762_v52 = vperm.slane %v1636_v12, %v1761_v33 }
 0x2be   : > { %v1764_v5 = vsel %vm1763_vm3, %v1762_v52, %v3404_v1 }
 0x2c0   : > { %1738 = vadd.xlane.f32.xlu1 %v1737_v49 }
 0x2c1   : > { %1735 = vadd.xlane.f32.xlu2 %v1734_v9 }
 0x2c3   : > { %v1639_v31 = vpop.xlane.xlu2 %1638 }
 0x2c4   : > { %v1766_v35 = vperm.slane %v1639_v31, %v1765_v39 }
 0x2c6   : > { %v1768_v42 = vsel %vm1767_vm4, %v1766_v35, %v1764_v5 }
 0x2cb   : > { %v3411_v40 = vpop.xlane.xlu1 %1641 }
 0x2cc   : > { %v1770_v32 = vperm.slane %v3411_v40, %v1769_v50 }
 0x2ce   : > { %v1772_v59 = vsel %vm1771_vm5, %v1770_v32, %v1768_v42 }
 0x2d3   : > { %v1645_v0 = vpop.xlane.xlu2 %1644 }
 0x2d4   : > { %v1774_v19 = vperm.slane %v1645_v0, %v1773_v43 }
 0x2d6   : > { %v1776_v11 = vsel %vm1775_vm6, %v1774_v19, %v1772_v59 }
 0x2db   : > { %v3413_v8 = vpop.xlane.xlu0 %1647 }
 0x2dc   : > { %v1778_v22 = vperm.slane %v3413_v8, %v1777_v10 }
 0x2de   : > { %v1780_v9 = vsel %vm1779_vm7, %v1778_v22, %v1776_v11 }
 0x2e3   : > { %v3415_v14 = vpop.xlane.xlu1 %1650 }
 0x2e4   : > { %v1782_v2 = vperm.slane %v3415_v14, %v1781_v62 }
 0x2e6   : > { %v1784_v14 = vsel %vm1783_vm8, %v1782_v2, %v1780_v9 }
 0x2eb   : > { %v3423_v37 = vpop.xlane.xlu2 %1653 }
 0x2f3   : > { %v3417_v21 = vpop.xlane.xlu0 %1656 }
 0x2f4   : > { %v1790_v49 = vperm.slane %v3417_v21, %v1789_v7 }
 0x2fb   : > { %v3419_v29 = vpop.xlane.xlu1 %1659  ;;  %v3421_v38 = vpop.xlane.xlu0 %1665 }
 0x2fc   : > { %v1794_v12 = vperm.slane %v3419_v29, %v1793_v20 }
 0x303   : > { %v1694_v45 = vpop.xlane.xlu1 %1693  ;;  %v1700_v15 = vpop.xlane.xlu0 %1699 }
 0x304   : > { %v3425_v6 = vpop.xlane.xlu2 %1662  ;;  %v1834_v3 = vperm.slane %v1694_v45, %v2421_v58  ;;  %v1837_v4 = vperm.slane %v1700_v15, %v1761_v33  ;;  %v1801_v15 = vadd.s32 4294967200, %v2421_v58 }
 0x305   : > { %v1798_v0 = vperm.slane %v3425_v6, %v1797_v25 }
 0x306   : > { %v1802_v33 = vperm.slane %v3421_v38, %v1801_v15 }
 0x30b   : > { %v1703_v60 = vpop.xlane.xlu1 %1702  ;;  %v1709_v30 = vpop.xlane.xlu0 %1708 }
 0x30c   : > { %v1697_v61 = vpop.xlane.xlu2 %1696  ;;  %v1839_v18 = vperm.slane %v1703_v60, %v1765_v39  ;;  %v1843_v36 = vperm.slane %v1709_v30, %v1773_v43  ;;  %v1805_v30 = vadd.s32 4294967192, %v2421_v58 }
 0x30d   : > { %v1835_v47 = vperm.slane %v1697_v61, %v1757_v34  ;;  %v1785_v34 = vadd.s32 4294967232, %v2421_v58 }
 0x30f   : > { %v1836_v24 = vsel %vm1759_vm0, %v1835_v47, %v1834_v3  ;;  %v1786_v46 = vperm.slane %v3423_v37, %v1785_v34 }
 0x310   : > { %v1838_v57 = vsel %vm1763_vm3, %v1837_v4, %v1836_v24 }
 0x311   : > { %v1840_v51 = vsel %vm1767_vm4, %v1839_v18, %v1838_v57  ;;  %v1788_v45 = vsel %vm1787_vm9, %v1786_v46, %v1784_v14 }
 0x312   : > { %v1792_v60 = vsel %vm1791_vm10, %v1790_v49, %v1788_v45 }
 0x313   : > { %v1712_v56 = vpop.xlane.xlu1 %1711  ;;  %v1718_v48 = vpop.xlane.xlu0 %1717 }
 0x314   : > { %v1706_v28 = vpop.xlane.xlu2 %1705  ;;  %v1845_v44 = vperm.slane %v1712_v56, %v1777_v10  ;;  %v1849_v63 = vperm.slane %v1718_v48, %v1785_v34  ;;  %v1796_v56 = vsel %vm1795_vm11, %v1794_v12, %v1792_v60 }
 0x315   : > { %v1841_v53 = vperm.slane %v1706_v28, %v1769_v50  ;;  %v1809_v28 = vadd.s32 4294967184, %v2421_v58  ;;  %v1800_v6 = vsel %vm1799_vm12, %v1798_v0, %v1796_v56 }
 0x316   : > { %v1804_v39 = vsel %vm1803_vm13, %v1802_v33, %v1800_v6 }
 0x317   : > { %v1842_v23 = vsel %vm1771_vm5, %v1841_v53, %v1840_v51  ;;  %v1813_v53 = vadd.s32 4294967176, %v2421_v58 }
 0x318   : > { %v1844_v54 = vsel %vm1775_vm6, %v1843_v36, %v1842_v23 }
 0x319   : > { %v1846_v41 = vsel %vm1779_vm7, %v1845_v44, %v1844_v54 }
 0x31b   : > { %v1721_v17 = vpop.xlane.xlu1 %1720  ;;  %v1727_v27 = vpop.xlane.xlu0 %1726 }
 0x31c   : > { %v1715_v16 = vpop.xlane.xlu2 %1714  ;;  %v1851_v37 = vperm.slane %v1721_v17, %v1789_v7  ;;  %v1855_v48 = vperm.slane %v1727_v27, %v1797_v25 }
 0x31d   : > { %v1847_v13 = vperm.slane %v1715_v16, %v1781_v62 }
 0x31f   : > { %v1848_v1 = vsel %vm1783_vm8, %v1847_v13, %v1846_v41 }
 0x320   : > { %v1850_v40 = vsel %vm1787_vm9, %v1849_v63, %v1848_v1 }
 0x321   : > { %v1852_v29 = vsel %vm1791_vm10, %v1851_v37, %v1850_v40 }
 0x323   : > { %v1730_v55 = vpop.xlane.xlu1 %1729  ;;  %v1733_v31 = vpop.xlane.xlu0 %1732 }
 0x324   : > { %v1724_v26 = vpop.xlane.xlu2 %1723  ;;  %v1857_v50 = vperm.slane %v1730_v55, %v1801_v15  ;;  %v1859_v43 = vperm.slane %v1733_v31, %v1805_v30 }
 0x325   : > { %v1853_v8 = vperm.slane %v1724_v26, %v1793_v20 }
 0x327   : > { %v1854_v47 = vsel %vm1795_vm11, %v1853_v8, %v1852_v29 }
 0x328   : > { %v1856_v24 = vsel %vm1799_vm12, %v1855_v48, %v1854_v47 }
 0x329   : > { %v1858_v17 = vsel %vm1803_vm13, %v1857_v50, %v1856_v24 }
 0x32a   : > { %v1860_v52 = vsel %vm1807_vm14, %v1859_v43, %v1858_v17 }
 0x32b   : > { %v1672_v21 = vpop.xlane.xlu1 %1671  ;;  %v1675_v18 = vpop.xlane.xlu0 %1674 }
 0x32c   : > { %v1669_v61 = vpop.xlane.xlu2 %1668  ;;  %v1810_v4 = vperm.slane %v1672_v21, %v1809_v28  ;;  %v1814_v62 = vperm.slane %v1675_v18, %v1813_v53 }
 0x32d   : > { %v1806_v3 = vperm.slane %v1669_v61, %v1805_v30 }
 0x32f   : > { %v1808_v57 = vsel %vm1807_vm14, %v1806_v3, %v1804_v39 }
 0x330   : > { %v1812_v27 = vsel %vm1811_vm15, %v1810_v4, %v1808_v57 }
 0x331   : > { %v1816_v58 = vsel %vm1815_vm1, %v1814_v62, %v1812_v27 }
 0x333   : > { %v1739_v16 = vpop.xlane.xlu1 %1738 }
 0x334   : > { %v1736_v51 = vpop.xlane.xlu2 %1735  ;;  %v1863_v23 = vperm.slane %v1739_v16, %v1813_v53 }
 0x335   : > { %v1861_v38 = vperm.slane %v1736_v51, %v1809_v28 }
 0x337   : > { %v1862_v36 = vsel %vm1811_vm15, %v1861_v38, %v1860_v52 }
 0x338   : > { %v1864_v10 = vsel %vm1815_vm1, %v1863_v23, %v1862_v36 }
 0x339   : > { %v1867_v35 = vsel %vm1866_vm2, %v1816_v58, %v1864_v10 }
 0x33a   : > { %1868 = vst [vmem:[%s268_s13] sm:$0x3] %v1867_v35 }
 0x33b PF: > { %s15_s18 = sadd.s32 1, %s2191_s18  }
 0x33c   : > { %p12_p5 = scmp.ge.s32.totalorder %s15_s18, 4  }
 0x33e   :  { %14 = sbr.rel (!%p12_p5) target bundleno = 1 (0x1), region = 76 }

</bundles_post_ra>
